<compile_context>
chip_gen: v7x
topology: tpu7x:2x2x1
jax: 0.10.0
libtpu: 0.0.40
codegen_flags: <defaults>
</compile_context>

<pallas_src>
import jax
import jax.numpy as jnp
from jax.experimental import pallas as pl
from jax.experimental.pallas import tpu as pltpu

LRELU_SLOPE = 0.1
LN_EPS = 1e-5


def _leaky(x):
    return jnp.where(x > 0, x, LRELU_SLOPE * x)


def _layernorm(x, gamma, beta):
    mu = jnp.mean(x, axis=-1, keepdims=True)
    var = jnp.mean((x - mu) ** 2, axis=-1, keepdims=True)
    return (x - mu) * jax.lax.rsqrt(var + LN_EPS) * gamma + beta


def node_decoder_kernel(z0_ref, ts_ref,
                        w0z_ref, aux_h_ref, w1_ref, aux_d_ref,
                        wl_ref, wo_ref, bo_ref,
                        xs_ref, zs_ref):
    # Static sizes.
    T = ts_ref.shape[0] - 1
    B = z0_ref.shape[0]

    # Unpack the packed per-row parameter blocks (static slices, zero-cost).
    w0t = aux_h_ref[0:1, :]   # (1, H)  t-column of MLPODEF layer-0 weight
    b0 = aux_h_ref[1:2, :]    # (1, H)
    g0 = aux_h_ref[2:3, :]    # (1, H)
    be0 = aux_h_ref[3:4, :]   # (1, H)
    bl = aux_h_ref[4:5, :]    # (1, H)  latent2hidden bias
    b1 = aux_d_ref[0:1, :]    # (1, D)
    g1 = aux_d_ref[1:2, :]    # (1, D)
    be1 = aux_d_ref[2:3, :]   # (1, D)

    w0z = w0z_ref[...]        # (D, H)
    w1 = w1_ref[...]          # (H, D)

    # --- ODE recurrence (sequential in time, z carried in vregs) ---------------
    # TODO(synk): NeuralODE / ode_solver_factory are not provided; one explicit
    # Euler step per requested time interval is used as the solver.
    def step(i, z):
        t = ts_ref[i]                 # (B, 1) start of interval
        dt = ts_ref[i + 1] - t        # (B, 1) interval length

        # MLPODEF layer 0: cat([z, t]) @ W0 == z @ W0[:D] + t * W0[D:D+1]
        h = jnp.dot(z, w0z, preferred_element_type=jnp.float32)
        h = h + t * w0t + b0
        h = _leaky(_layernorm(h, g0, be0))

        # MLPODEF layer 1
        dz = jnp.dot(h, w1, preferred_element_type=jnp.float32) + b1
        dz = _leaky(_layernorm(dz, g1, be1))

        z_new = z + dt * dz
        zs_ref[pl.ds(i * B, B), :] = z_new     # stage into the flat zs block
        return z_new

    jax.lax.fori_loop(0, T, step, z0_ref[...], unroll=True)

    # --- Decoder head, hoisted out of the recurrence --------------------------
    # One batched (T*B, D) @ (D, H) and (T*B, H) @ (H, O) instead of 2T tiny dots.
    zf = zs_ref[...]                                                     # (T*B, D)
    hs = _leaky(jnp.dot(zf, wl_ref[...], preferred_element_type=jnp.float32) + bl)
    xs_ref[...] = (jnp.dot(hs, wo_ref[...], preferred_element_type=jnp.float32)
                   + bo_ref[...])


def node_decoder_forward(z0, ts, params):
    T, B, _ = ts.shape
    D = z0.shape[-1]
    O = params["wo"].shape[-1]

    z0 = z0.astype(jnp.float32)

    # Glue from the PyTorch forward: t0 = zeros, ts_all = cat([t0, ts], dim=0).
    t0 = jnp.zeros((1, B, 1), jnp.float32)
    ts_all = jnp.concatenate([t0, ts.astype(jnp.float32)], axis=0)   # (T+1, B, 1)

    # Pack small per-feature params into two row-stacked blocks (fewer DMAs /
    # fewer double-buffered VMEM slots).
    aux_h = jnp.concatenate(
        [params["w0t"], params["b0"], params["g0"], params["be0"], params["bl"]],
        axis=0)                                                       # (5, H)
    aux_d = jnp.concatenate(
        [params["b1"], params["g1"], params["be1"]], axis=0)          # (3, D)

    inputs = (z0, ts_all, params["w0z"], aux_h, params["w1"], aux_d,
              params["wl"], params["wo"], params["bo"])

    def full_spec(arr):
        nd = arr.ndim
        return pl.BlockSpec(arr.shape, lambda i, _nd=nd: (0,) * _nd)

    # NOTE: at production T*B sizes the flat staging blocks should be budgeted
    # against VMEM (64 MiB on v7x) and chunked over T if necessary.
    out_shapes = (jax.ShapeDtypeStruct((T * B, O), jnp.float32),
                  jax.ShapeDtypeStruct((T * B, D), jnp.float32))
    out_specs = [pl.BlockSpec((T * B, O), lambda i: (0, 0)),
                 pl.BlockSpec((T * B, D), lambda i: (0, 0))]

    xs_flat, zs_flat = pl.pallas_call(
        node_decoder_kernel,
        out_shape=out_shapes,
        grid_spec=pltpu.PrefetchScalarGridSpec(
            num_scalar_prefetch=0,
            grid=(1,),
            in_specs=[full_spec(a) for a in inputs],
            out_specs=out_specs,
        ),
        compiler_params=pltpu.CompilerParams(
            dimension_semantics=("arbitrary",)),
    )(*inputs)

    # Free reshapes (leading-dim split) back to the module's (T, B, F) layout.
    return xs_flat.reshape(T, B, O), zs_flat.reshape(T, B, D)


def reference(z0, ts, p):
    """Pure-JAX reference of the same semantics (Euler NODE + decoder head)."""
    T, B, _ = ts.shape
    t0 = jnp.zeros((1, B, 1), jnp.float32)
    ts_all = jnp.concatenate([t0, ts], 0)

    def ln(x, g, b):
        mu = x.mean(-1, keepdims=True)
        var = ((x - mu) ** 2).mean(-1, keepdims=True)
        return (x - mu) / jnp.sqrt(var + LN_EPS) * g + b

    def lrelu(x):
        return jnp.where(x > 0, x, LRELU_SLOPE * x)

    W0 = jnp.concatenate([p["w0z"], p["w0t"]], axis=0)

    def f(z, t):
        zt = jnp.concatenate([z, t], -1)
        h = lrelu(ln(zt @ W0 + p["b0"], p["g0"], p["be0"]))
        return lrelu(ln(h @ p["w1"] + p["b1"], p["g1"], p["be1"]))

    zs = []
    z = z0
    for i in range(T):
        dt = ts_all[i + 1] - ts_all[i]
        z = z + dt * f(z, ts_all[i])
        zs.append(z)
    zs = jnp.stack(zs, 0)
    hs = lrelu(zs @ p["wl"] + p["bl"])
    xs = hs @ p["wo"] + p["bo"]
    return xs, zs


if __name__ == "__main__":
    key = jax.random.PRNGKey(0)
    B, T = 2, 8
    D, H, O = 8, 32, 4          # latent_dim, hidden_dim, output_dim
    ks = jax.random.split(key, 12)
    s = 0.1

    params = {
        # MLPODEF layer 0: Linear(D+1 -> H), LayerNorm(H)
        "w0z": jax.random.normal(ks[0], (D, H), jnp.float32) * s,
        "w0t": jax.random.normal(ks[1], (1, H), jnp.float32) * s,
        "b0":  jax.random.normal(ks[2], (1, H), jnp.float32) * s,
        "g0":  jnp.ones((1, H), jnp.float32),
        "be0": jnp.zeros((1, H), jnp.float32),
        # MLPODEF layer 1: Linear(H -> D), LayerNorm(D)
        "w1":  jax.random.normal(ks[3], (H, D), jnp.float32) * s,
        "b1":  jax.random.normal(ks[4], (1, D), jnp.float32) * s,
        "g1":  jnp.ones((1, D), jnp.float32),
        "be1": jnp.zeros((1, D), jnp.float32),
        # latent2hidden / hidden2output
        "wl":  jax.random.normal(ks[5], (D, H), jnp.float32) * s,
        "bl":  jax.random.normal(ks[6], (1, H), jnp.float32) * s,
        "wo":  jax.random.normal(ks[7], (H, O), jnp.float32) * s,
        "bo":  jax.random.normal(ks[8], (1, O), jnp.float32) * s,
    }

    z0 = jax.random.normal(ks[9], (B, D), jnp.float32)
    # strictly increasing per-batch times
    ts = jnp.cumsum(jax.random.uniform(ks[10], (T, B, 1), jnp.float32, 0.05, 0.2),
                    axis=0)

    xs, zs = node_decoder_forward(z0, ts, params)
    jax.block_until_ready((xs, zs))

    xs_ref, zs_ref = reference(z0, ts, params)
    assert xs.shape == (T, B, O) and zs.shape == (T, B, D)
    assert jnp.allclose(xs, xs_ref, atol=1e-4, rtol=1e-4)
    assert jnp.allclose(zs, zs_ref, atol=1e-4, rtol=1e-4)
    print("KERNEL_OK")
</pallas_src>

<mosaic_0001>
module attributes {stable_mosaic.version = 11 : i64} {
  func.func @node_decoder_kernel(%arg0: i32, %arg1: memref<2x8xf32, #tpu.memory_space<vmem>>, %arg2: memref<9x2x1xf32, #tpu.memory_space<vmem>>, %arg3: memref<8x32xf32, #tpu.memory_space<vmem>>, %arg4: memref<5x32xf32, #tpu.memory_space<vmem>>, %arg5: memref<32x8xf32, #tpu.memory_space<vmem>>, %arg6: memref<3x8xf32, #tpu.memory_space<vmem>>, %arg7: memref<8x32xf32, #tpu.memory_space<vmem>>, %arg8: memref<32x4xf32, #tpu.memory_space<vmem>>, %arg9: memref<1x4xf32, #tpu.memory_space<vmem>>, %arg10: memref<16x4xf32, #tpu.memory_space<vmem>>, %arg11: memref<16x8xf32, #tpu.memory_space<vmem>>) attributes {dimension_semantics = [#tpu.dimension_semantics<arbitrary>], iteration_bounds = array<i64: 1>, scalar_prefetch = 0 : i64, scratch_operands = 0 : i64, tpu.core_type = #tpu.core_type<tc>, window_params = [{pipeline_mode = #tpu.pipeline_mode<synchronous>, transform_indices = @transform_0, window_bounds = array<i64: 2, 8>}, {pipeline_mode = #tpu.pipeline_mode<synchronous>, transform_indices = @transform_1, window_bounds = array<i64: 9, 2, 1>}, {pipeline_mode = #tpu.pipeline_mode<synchronous>, transform_indices = @transform_2, window_bounds = array<i64: 8, 32>}, {pipeline_mode = #tpu.pipeline_mode<synchronous>, transform_indices = @transform_3, window_bounds = array<i64: 5, 32>}, {pipeline_mode = #tpu.pipeline_mode<synchronous>, transform_indices = @transform_4, window_bounds = array<i64: 32, 8>}, {pipeline_mode = #tpu.pipeline_mode<synchronous>, transform_indices = @transform_5, window_bounds = array<i64: 3, 8>}, {pipeline_mode = #tpu.pipeline_mode<synchronous>, transform_indices = @transform_6, window_bounds = array<i64: 8, 32>}, {pipeline_mode = #tpu.pipeline_mode<synchronous>, transform_indices = @transform_7, window_bounds = array<i64: 32, 4>}, {pipeline_mode = #tpu.pipeline_mode<synchronous>, transform_indices = @transform_8, window_bounds = array<i64: 1, 4>}, {pipeline_mode = #tpu.pipeline_mode<synchronous>, transform_indices = @transform_9, window_bounds = array<i64: 16, 4>}, {pipeline_mode = #tpu.pipeline_mode<synchronous>, transform_indices = @transform_10, window_bounds = array<i64: 16, 8>}]} {
    %c0 = arith.constant 0 : index
    %c0_0 = arith.constant 0 : index
    %0 = vector.load %arg4[%c0, %c0_0] : memref<5x32xf32, #tpu.memory_space<vmem>>, vector<1x32xf32>
    %c1 = arith.constant 1 : index
    %c0_1 = arith.constant 0 : index
    %1 = vector.load %arg4[%c1, %c0_1] : memref<5x32xf32, #tpu.memory_space<vmem>>, vector<1x32xf32>
    %c2 = arith.constant 2 : index
    %c0_2 = arith.constant 0 : index
    %2 = vector.load %arg4[%c2, %c0_2] : memref<5x32xf32, #tpu.memory_space<vmem>>, vector<1x32xf32>
    %c3 = arith.constant 3 : index
    %c0_3 = arith.constant 0 : index
    %3 = vector.load %arg4[%c3, %c0_3] : memref<5x32xf32, #tpu.memory_space<vmem>>, vector<1x32xf32>
    %c4 = arith.constant 4 : index
    %c0_4 = arith.constant 0 : index
    %4 = vector.load %arg4[%c4, %c0_4] : memref<5x32xf32, #tpu.memory_space<vmem>>, vector<1x32xf32>
    %c0_5 = arith.constant 0 : index
    %c0_6 = arith.constant 0 : index
    %5 = vector.load %arg6[%c0_5, %c0_6] : memref<3x8xf32, #tpu.memory_space<vmem>>, vector<1x8xf32>
    %c1_7 = arith.constant 1 : index
    %c0_8 = arith.constant 0 : index
    %6 = vector.load %arg6[%c1_7, %c0_8] : memref<3x8xf32, #tpu.memory_space<vmem>>, vector<1x8xf32>
    %c2_9 = arith.constant 2 : index
    %c0_10 = arith.constant 0 : index
    %7 = vector.load %arg6[%c2_9, %c0_10] : memref<3x8xf32, #tpu.memory_space<vmem>>, vector<1x8xf32>
    %c0_11 = arith.constant 0 : index
    %c0_12 = arith.constant 0 : index
    %8 = vector.load %arg3[%c0_11, %c0_12] : memref<8x32xf32, #tpu.memory_space<vmem>>, vector<8x32xf32>
    %c0_13 = arith.constant 0 : index
    %c0_14 = arith.constant 0 : index
    %9 = vector.load %arg5[%c0_13, %c0_14] : memref<32x8xf32, #tpu.memory_space<vmem>>, vector<32x8xf32>
    %c0_15 = arith.constant 0 : index
    %c0_16 = arith.constant 0 : index
    %10 = vector.load %arg1[%c0_15, %c0_16] : memref<2x8xf32, #tpu.memory_space<vmem>>, vector<2x8xf32>
    %c0_i32 = arith.constant 0 : i32
    %11 = arith.index_cast %c0_i32 : i32 to index
    %c0_17 = arith.constant 0 : index
    %c0_18 = arith.constant 0 : index
    %12 = vector.load %arg2[%11, %c0_17, %c0_18] : memref<9x2x1xf32, #tpu.memory_space<vmem>>, vector<1x2x1xf32>
    %13 = vector.shape_cast %12 : vector<1x2x1xf32> to vector<2x1xf32>
    %c1_i32 = arith.constant 1 : i32
    %14 = arith.addi %c0_i32, %c1_i32 : i32
    %15 = arith.index_cast %14 : i32 to index
    %c0_19 = arith.constant 0 : index
    %c0_20 = arith.constant 0 : index
    %16 = vector.load %arg2[%15, %c0_19, %c0_20] : memref<9x2x1xf32, #tpu.memory_space<vmem>>, vector<1x2x1xf32>
    %17 = vector.shape_cast %16 : vector<1x2x1xf32> to vector<2x1xf32>
    %18 = arith.subf %17, %13 : vector<2x1xf32>
    %cst = arith.constant dense<0.000000e+00> : vector<2x32xf32>
    %19 = tpu.matmul %10, %8, %cst {dimension_numbers = #tpu.dot_dimension_numbers<[1], [0], [0], [1], [0, 0, 1, 1], [], []>} : vector<2x8xf32>, vector<8x32xf32>, vector<2x32xf32> -> vector<2x32xf32>
    %20 = vector.broadcast %13 : vector<2x1xf32> to vector<2x32xf32>
    %21 = vector.broadcast %0 : vector<1x32xf32> to vector<2x32xf32>
    %22 = arith.mulf %20, %21 : vector<2x32xf32>
    %23 = arith.addf %19, %22 : vector<2x32xf32>
    %24 = vector.broadcast %1 : vector<1x32xf32> to vector<2x32xf32>
    %25 = arith.addf %23, %24 : vector<2x32xf32>
    %cst_21 = arith.constant dense<0.000000e+00> : vector<2xf32>
    %26 = vector.multi_reduction <add>, %25, %cst_21 [1] : vector<2x32xf32> to vector<2xf32>
    %27 = vector.shape_cast %26 : vector<2xf32> to vector<2x1xf32>
    %cst_22 = arith.constant 3.200000e+01 : f32
    %28 = vector.broadcast %cst_22 : f32 to vector<2x1xf32>
    %29 = arith.divf %27, %28 : vector<2x1xf32>
    %30 = vector.broadcast %29 : vector<2x1xf32> to vector<2x32xf32>
    %31 = arith.subf %25, %30 : vector<2x32xf32>
    %32 = arith.mulf %31, %31 : vector<2x32xf32>
    %cst_23 = arith.constant dense<0.000000e+00> : vector<2xf32>
    %33 = vector.multi_reduction <add>, %32, %cst_23 [1] : vector<2x32xf32> to vector<2xf32>
    %34 = vector.shape_cast %33 : vector<2xf32> to vector<2x1xf32>
    %cst_24 = arith.constant 3.200000e+01 : f32
    %35 = vector.broadcast %cst_24 : f32 to vector<2x1xf32>
    %36 = arith.divf %34, %35 : vector<2x1xf32>
    %37 = vector.broadcast %29 : vector<2x1xf32> to vector<2x32xf32>
    %38 = arith.subf %25, %37 : vector<2x32xf32>
    %cst_25 = arith.constant 9.99999974E-6 : f32
    %39 = vector.broadcast %cst_25 : f32 to vector<2x1xf32>
    %40 = arith.addf %36, %39 : vector<2x1xf32>
    %41 = math.rsqrt %40 : vector<2x1xf32>
    %42 = vector.broadcast %41 : vector<2x1xf32> to vector<2x32xf32>
    %43 = arith.mulf %38, %42 : vector<2x32xf32>
    %44 = vector.broadcast %2 : vector<1x32xf32> to vector<2x32xf32>
    %45 = arith.mulf %43, %44 : vector<2x32xf32>
    %46 = vector.broadcast %3 : vector<1x32xf32> to vector<2x32xf32>
    %47 = arith.addf %45, %46 : vector<2x32xf32>
    %cst_26 = arith.constant 0.000000e+00 : f32
    %48 = vector.broadcast %cst_26 : f32 to vector<2x32xf32>
    %49 = arith.cmpf ogt, %47, %48 : vector<2x32xf32>
    %cst_27 = arith.constant 1.000000e-01 : f32
    %50 = vector.broadcast %cst_27 : f32 to vector<2x32xf32>
    %51 = arith.mulf %50, %47 : vector<2x32xf32>
    %52 = arith.select %49, %47, %51 : vector<2x32xi1>, vector<2x32xf32>
    %cst_28 = arith.constant dense<0.000000e+00> : vector<2x8xf32>
    %53 = tpu.matmul %52, %9, %cst_28 {dimension_numbers = #tpu.dot_dimension_numbers<[1], [0], [0], [1], [0, 0, 1, 1], [], []>} : vector<2x32xf32>, vector<32x8xf32>, vector<2x8xf32> -> vector<2x8xf32>
    %54 = vector.broadcast %5 : vector<1x8xf32> to vector<2x8xf32>
    %55 = arith.addf %53, %54 : vector<2x8xf32>
    %cst_29 = arith.constant dense<0.000000e+00> : vector<2xf32>
    %56 = vector.multi_reduction <add>, %55, %cst_29 [1] : vector<2x8xf32> to vector<2xf32>
    %57 = vector.shape_cast %56 : vector<2xf32> to vector<2x1xf32>
    %cst_30 = arith.constant 8.000000e+00 : f32
    %58 = vector.broadcast %cst_30 : f32 to vector<2x1xf32>
    %59 = arith.divf %57, %58 : vector<2x1xf32>
    %60 = vector.broadcast %59 : vector<2x1xf32> to vector<2x8xf32>
    %61 = arith.subf %55, %60 : vector<2x8xf32>
    %62 = arith.mulf %61, %61 : vector<2x8xf32>
    %cst_31 = arith.constant dense<0.000000e+00> : vector<2xf32>
    %63 = vector.multi_reduction <add>, %62, %cst_31 [1] : vector<2x8xf32> to vector<2xf32>
    %64 = vector.shape_cast %63 : vector<2xf32> to vector<2x1xf32>
    %cst_32 = arith.constant 8.000000e+00 : f32
    %65 = vector.broadcast %cst_32 : f32 to vector<2x1xf32>
    %66 = arith.divf %64, %65 : vector<2x1xf32>
    %67 = vector.broadcast %59 : vector<2x1xf32> to vector<2x8xf32>
    %68 = arith.subf %55, %67 : vector<2x8xf32>
    %cst_33 = arith.constant 9.99999974E-6 : f32
    %69 = vector.broadcast %cst_33 : f32 to vector<2x1xf32>
    %70 = arith.addf %66, %69 : vector<2x1xf32>
    %71 = math.rsqrt %70 : vector<2x1xf32>
    %72 = vector.broadcast %71 : vector<2x1xf32> to vector<2x8xf32>
    %73 = arith.mulf %68, %72 : vector<2x8xf32>
    %74 = vector.broadcast %6 : vector<1x8xf32> to vector<2x8xf32>
    %75 = arith.mulf %73, %74 : vector<2x8xf32>
    %76 = vector.broadcast %7 : vector<1x8xf32> to vector<2x8xf32>
    %77 = arith.addf %75, %76 : vector<2x8xf32>
    %cst_34 = arith.constant 0.000000e+00 : f32
    %78 = vector.broadcast %cst_34 : f32 to vector<2x8xf32>
    %79 = arith.cmpf ogt, %77, %78 : vector<2x8xf32>
    %cst_35 = arith.constant 1.000000e-01 : f32
    %80 = vector.broadcast %cst_35 : f32 to vector<2x8xf32>
    %81 = arith.mulf %80, %77 : vector<2x8xf32>
    %82 = arith.select %79, %77, %81 : vector<2x8xi1>, vector<2x8xf32>
    %83 = vector.broadcast %18 : vector<2x1xf32> to vector<2x8xf32>
    %84 = arith.mulf %83, %82 : vector<2x8xf32>
    %85 = arith.addf %10, %84 : vector<2x8xf32>
    %c2_i32 = arith.constant 2 : i32
    %86 = arith.muli %c0_i32, %c2_i32 : i32
    %87 = arith.index_cast %86 : i32 to index
    %c0_36 = arith.constant 0 : index
    %88 = vector.load %arg11[%87, %c0_36] : memref<16x8xf32, #tpu.memory_space<vmem>>, vector<2x8xf32>
    tpu.vector_store %arg11[%87, %c0_36], %85 {strides = array<i32>} : memref<16x8xf32, #tpu.memory_space<vmem>>, vector<2x8xf32>,
    %c1_i32_37 = arith.constant 1 : i32
    %89 = arith.index_cast %c1_i32_37 : i32 to index
    %c0_38 = arith.constant 0 : index
    %c0_39 = arith.constant 0 : index
    %90 = vector.load %arg2[%89, %c0_38, %c0_39] : memref<9x2x1xf32, #tpu.memory_space<vmem>>, vector<1x2x1xf32>
    %91 = vector.shape_cast %90 : vector<1x2x1xf32> to vector<2x1xf32>
    %c1_i32_40 = arith.constant 1 : i32
    %92 = arith.addi %c1_i32_37, %c1_i32_40 : i32
    %93 = arith.index_cast %92 : i32 to index
    %c0_41 = arith.constant 0 : index
    %c0_42 = arith.constant 0 : index
    %94 = vector.load %arg2[%93, %c0_41, %c0_42] : memref<9x2x1xf32, #tpu.memory_space<vmem>>, vector<1x2x1xf32>
    %95 = vector.shape_cast %94 : vector<1x2x1xf32> to vector<2x1xf32>
    %96 = arith.subf %95, %91 : vector<2x1xf32>
    %cst_43 = arith.constant dense<0.000000e+00> : vector<2x32xf32>
    %97 = tpu.matmul %85, %8, %cst_43 {dimension_numbers = #tpu.dot_dimension_numbers<[1], [0], [0], [1], [0, 0, 1, 1], [], []>} : vector<2x8xf32>, vector<8x32xf32>, vector<2x32xf32> -> vector<2x32xf32>
    %98 = vector.broadcast %91 : vector<2x1xf32> to vector<2x32xf32>
    %99 = vector.broadcast %0 : vector<1x32xf32> to vector<2x32xf32>
    %100 = arith.mulf %98, %99 : vector<2x32xf32>
    %101 = arith.addf %97, %100 : vector<2x32xf32>
    %102 = vector.broadcast %1 : vector<1x32xf32> to vector<2x32xf32>
    %103 = arith.addf %101, %102 : vector<2x32xf32>
    %cst_44 = arith.constant dense<0.000000e+00> : vector<2xf32>
    %104 = vector.multi_reduction <add>, %103, %cst_44 [1] : vector<2x32xf32> to vector<2xf32>
    %105 = vector.shape_cast %104 : vector<2xf32> to vector<2x1xf32>
    %cst_45 = arith.constant 3.200000e+01 : f32
    %106 = vector.broadcast %cst_45 : f32 to vector<2x1xf32>
    %107 = arith.divf %105, %106 : vector<2x1xf32>
    %108 = vector.broadcast %107 : vector<2x1xf32> to vector<2x32xf32>
    %109 = arith.subf %103, %108 : vector<2x32xf32>
    %110 = arith.mulf %109, %109 : vector<2x32xf32>
    %cst_46 = arith.constant dense<0.000000e+00> : vector<2xf32>
    %111 = vector.multi_reduction <add>, %110, %cst_46 [1] : vector<2x32xf32> to vector<2xf32>
    %112 = vector.shape_cast %111 : vector<2xf32> to vector<2x1xf32>
    %cst_47 = arith.constant 3.200000e+01 : f32
    %113 = vector.broadcast %cst_47 : f32 to vector<2x1xf32>
    %114 = arith.divf %112, %113 : vector<2x1xf32>
    %115 = vector.broadcast %107 : vector<2x1xf32> to vector<2x32xf32>
    %116 = arith.subf %103, %115 : vector<2x32xf32>
    %cst_48 = arith.constant 9.99999974E-6 : f32
    %117 = vector.broadcast %cst_48 : f32 to vector<2x1xf32>
    %118 = arith.addf %114, %117 : vector<2x1xf32>
    %119 = math.rsqrt %118 : vector<2x1xf32>
    %120 = vector.broadcast %119 : vector<2x1xf32> to vector<2x32xf32>
    %121 = arith.mulf %116, %120 : vector<2x32xf32>
    %122 = vector.broadcast %2 : vector<1x32xf32> to vector<2x32xf32>
    %123 = arith.mulf %121, %122 : vector<2x32xf32>
    %124 = vector.broadcast %3 : vector<1x32xf32> to vector<2x32xf32>
    %125 = arith.addf %123, %124 : vector<2x32xf32>
    %cst_49 = arith.constant 0.000000e+00 : f32
    %126 = vector.broadcast %cst_49 : f32 to vector<2x32xf32>
    %127 = arith.cmpf ogt, %125, %126 : vector<2x32xf32>
    %cst_50 = arith.constant 1.000000e-01 : f32
    %128 = vector.broadcast %cst_50 : f32 to vector<2x32xf32>
    %129 = arith.mulf %128, %125 : vector<2x32xf32>
    %130 = arith.select %127, %125, %129 : vector<2x32xi1>, vector<2x32xf32>
    %cst_51 = arith.constant dense<0.000000e+00> : vector<2x8xf32>
    %131 = tpu.matmul %130, %9, %cst_51 {dimension_numbers = #tpu.dot_dimension_numbers<[1], [0], [0], [1], [0, 0, 1, 1], [], []>} : vector<2x32xf32>, vector<32x8xf32>, vector<2x8xf32> -> vector<2x8xf32>
    %132 = vector.broadcast %5 : vector<1x8xf32> to vector<2x8xf32>
    %133 = arith.addf %131, %132 : vector<2x8xf32>
    %cst_52 = arith.constant dense<0.000000e+00> : vector<2xf32>
    %134 = vector.multi_reduction <add>, %133, %cst_52 [1] : vector<2x8xf32> to vector<2xf32>
    %135 = vector.shape_cast %134 : vector<2xf32> to vector<2x1xf32>
    %cst_53 = arith.constant 8.000000e+00 : f32
    %136 = vector.broadcast %cst_53 : f32 to vector<2x1xf32>
    %137 = arith.divf %135, %136 : vector<2x1xf32>
    %138 = vector.broadcast %137 : vector<2x1xf32> to vector<2x8xf32>
    %139 = arith.subf %133, %138 : vector<2x8xf32>
    %140 = arith.mulf %139, %139 : vector<2x8xf32>
    %cst_54 = arith.constant dense<0.000000e+00> : vector<2xf32>
    %141 = vector.multi_reduction <add>, %140, %cst_54 [1] : vector<2x8xf32> to vector<2xf32>
    %142 = vector.shape_cast %141 : vector<2xf32> to vector<2x1xf32>
    %cst_55 = arith.constant 8.000000e+00 : f32
    %143 = vector.broadcast %cst_55 : f32 to vector<2x1xf32>
    %144 = arith.divf %142, %143 : vector<2x1xf32>
    %145 = vector.broadcast %137 : vector<2x1xf32> to vector<2x8xf32>
    %146 = arith.subf %133, %145 : vector<2x8xf32>
    %cst_56 = arith.constant 9.99999974E-6 : f32
    %147 = vector.broadcast %cst_56 : f32 to vector<2x1xf32>
    %148 = arith.addf %144, %147 : vector<2x1xf32>
    %149 = math.rsqrt %148 : vector<2x1xf32>
    %150 = vector.broadcast %149 : vector<2x1xf32> to vector<2x8xf32>
    %151 = arith.mulf %146, %150 : vector<2x8xf32>
    %152 = vector.broadcast %6 : vector<1x8xf32> to vector<2x8xf32>
    %153 = arith.mulf %151, %152 : vector<2x8xf32>
    %154 = vector.broadcast %7 : vector<1x8xf32> to vector<2x8xf32>
    %155 = arith.addf %153, %154 : vector<2x8xf32>
    %cst_57 = arith.constant 0.000000e+00 : f32
    %156 = vector.broadcast %cst_57 : f32 to vector<2x8xf32>
    %157 = arith.cmpf ogt, %155, %156 : vector<2x8xf32>
    %cst_58 = arith.constant 1.000000e-01 : f32
    %158 = vector.broadcast %cst_58 : f32 to vector<2x8xf32>
    %159 = arith.mulf %158, %155 : vector<2x8xf32>
    %160 = arith.select %157, %155, %159 : vector<2x8xi1>, vector<2x8xf32>
    %161 = vector.broadcast %96 : vector<2x1xf32> to vector<2x8xf32>
    %162 = arith.mulf %161, %160 : vector<2x8xf32>
    %163 = arith.addf %85, %162 : vector<2x8xf32>
    %c2_i32_59 = arith.constant 2 : i32
    %164 = arith.muli %c1_i32_37, %c2_i32_59 : i32
    %165 = arith.index_cast %164 : i32 to index
    %c0_60 = arith.constant 0 : index
    %166 = vector.load %arg11[%165, %c0_60] : memref<16x8xf32, #tpu.memory_space<vmem>>, vector<2x8xf32>
    tpu.vector_store %arg11[%165, %c0_60], %163 {strides = array<i32>} : memref<16x8xf32, #tpu.memory_space<vmem>>, vector<2x8xf32>,
    %c2_i32_61 = arith.constant 2 : i32
    %167 = arith.index_cast %c2_i32_61 : i32 to index
    %c0_62 = arith.constant 0 : index
    %c0_63 = arith.constant 0 : index
    %168 = vector.load %arg2[%167, %c0_62, %c0_63] : memref<9x2x1xf32, #tpu.memory_space<vmem>>, vector<1x2x1xf32>
    %169 = vector.shape_cast %168 : vector<1x2x1xf32> to vector<2x1xf32>
    %c1_i32_64 = arith.constant 1 : i32
    %170 = arith.addi %c2_i32_61, %c1_i32_64 : i32
    %171 = arith.index_cast %170 : i32 to index
    %c0_65 = arith.constant 0 : index
    %c0_66 = arith.constant 0 : index
    %172 = vector.load %arg2[%171, %c0_65, %c0_66] : memref<9x2x1xf32, #tpu.memory_space<vmem>>, vector<1x2x1xf32>
    %173 = vector.shape_cast %172 : vector<1x2x1xf32> to vector<2x1xf32>
    %174 = arith.subf %173, %169 : vector<2x1xf32>
    %cst_67 = arith.constant dense<0.000000e+00> : vector<2x32xf32>
    %175 = tpu.matmul %163, %8, %cst_67 {dimension_numbers = #tpu.dot_dimension_numbers<[1], [0], [0], [1], [0, 0, 1, 1], [], []>} : vector<2x8xf32>, vector<8x32xf32>, vector<2x32xf32> -> vector<2x32xf32>
    %176 = vector.broadcast %169 : vector<2x1xf32> to vector<2x32xf32>
    %177 = vector.broadcast %0 : vector<1x32xf32> to vector<2x32xf32>
    %178 = arith.mulf %176, %177 : vector<2x32xf32>
    %179 = arith.addf %175, %178 : vector<2x32xf32>
    %180 = vector.broadcast %1 : vector<1x32xf32> to vector<2x32xf32>
    %181 = arith.addf %179, %180 : vector<2x32xf32>
    %cst_68 = arith.constant dense<0.000000e+00> : vector<2xf32>
    %182 = vector.multi_reduction <add>, %181, %cst_68 [1] : vector<2x32xf32> to vector<2xf32>
    %183 = vector.shape_cast %182 : vector<2xf32> to vector<2x1xf32>
    %cst_69 = arith.constant 3.200000e+01 : f32
    %184 = vector.broadcast %cst_69 : f32 to vector<2x1xf32>
    %185 = arith.divf %183, %184 : vector<2x1xf32>
    %186 = vector.broadcast %185 : vector<2x1xf32> to vector<2x32xf32>
    %187 = arith.subf %181, %186 : vector<2x32xf32>
    %188 = arith.mulf %187, %187 : vector<2x32xf32>
    %cst_70 = arith.constant dense<0.000000e+00> : vector<2xf32>
    %189 = vector.multi_reduction <add>, %188, %cst_70 [1] : vector<2x32xf32> to vector<2xf32>
    %190 = vector.shape_cast %189 : vector<2xf32> to vector<2x1xf32>
    %cst_71 = arith.constant 3.200000e+01 : f32
    %191 = vector.broadcast %cst_71 : f32 to vector<2x1xf32>
    %192 = arith.divf %190, %191 : vector<2x1xf32>
    %193 = vector.broadcast %185 : vector<2x1xf32> to vector<2x32xf32>
    %194 = arith.subf %181, %193 : vector<2x32xf32>
    %cst_72 = arith.constant 9.99999974E-6 : f32
    %195 = vector.broadcast %cst_72 : f32 to vector<2x1xf32>
    %196 = arith.addf %192, %195 : vector<2x1xf32>
    %197 = math.rsqrt %196 : vector<2x1xf32>
    %198 = vector.broadcast %197 : vector<2x1xf32> to vector<2x32xf32>
    %199 = arith.mulf %194, %198 : vector<2x32xf32>
    %200 = vector.broadcast %2 : vector<1x32xf32> to vector<2x32xf32>
    %201 = arith.mulf %199, %200 : vector<2x32xf32>
    %202 = vector.broadcast %3 : vector<1x32xf32> to vector<2x32xf32>
    %203 = arith.addf %201, %202 : vector<2x32xf32>
    %cst_73 = arith.constant 0.000000e+00 : f32
    %204 = vector.broadcast %cst_73 : f32 to vector<2x32xf32>
    %205 = arith.cmpf ogt, %203, %204 : vector<2x32xf32>
    %cst_74 = arith.constant 1.000000e-01 : f32
    %206 = vector.broadcast %cst_74 : f32 to vector<2x32xf32>
    %207 = arith.mulf %206, %203 : vector<2x32xf32>
    %208 = arith.select %205, %203, %207 : vector<2x32xi1>, vector<2x32xf32>
    %cst_75 = arith.constant dense<0.000000e+00> : vector<2x8xf32>
    %209 = tpu.matmul %208, %9, %cst_75 {dimension_numbers = #tpu.dot_dimension_numbers<[1], [0], [0], [1], [0, 0, 1, 1], [], []>} : vector<2x32xf32>, vector<32x8xf32>, vector<2x8xf32> -> vector<2x8xf32>
    %210 = vector.broadcast %5 : vector<1x8xf32> to vector<2x8xf32>
    %211 = arith.addf %209, %210 : vector<2x8xf32>
    %cst_76 = arith.constant dense<0.000000e+00> : vector<2xf32>
    %212 = vector.multi_reduction <add>, %211, %cst_76 [1] : vector<2x8xf32> to vector<2xf32>
    %213 = vector.shape_cast %212 : vector<2xf32> to vector<2x1xf32>
    %cst_77 = arith.constant 8.000000e+00 : f32
    %214 = vector.broadcast %cst_77 : f32 to vector<2x1xf32>
    %215 = arith.divf %213, %214 : vector<2x1xf32>
    %216 = vector.broadcast %215 : vector<2x1xf32> to vector<2x8xf32>
    %217 = arith.subf %211, %216 : vector<2x8xf32>
    %218 = arith.mulf %217, %217 : vector<2x8xf32>
    %cst_78 = arith.constant dense<0.000000e+00> : vector<2xf32>
    %219 = vector.multi_reduction <add>, %218, %cst_78 [1] : vector<2x8xf32> to vector<2xf32>
    %220 = vector.shape_cast %219 : vector<2xf32> to vector<2x1xf32>
    %cst_79 = arith.constant 8.000000e+00 : f32
    %221 = vector.broadcast %cst_79 : f32 to vector<2x1xf32>
    %222 = arith.divf %220, %221 : vector<2x1xf32>
    %223 = vector.broadcast %215 : vector<2x1xf32> to vector<2x8xf32>
    %224 = arith.subf %211, %223 : vector<2x8xf32>
    %cst_80 = arith.constant 9.99999974E-6 : f32
    %225 = vector.broadcast %cst_80 : f32 to vector<2x1xf32>
    %226 = arith.addf %222, %225 : vector<2x1xf32>
    %227 = math.rsqrt %226 : vector<2x1xf32>
    %228 = vector.broadcast %227 : vector<2x1xf32> to vector<2x8xf32>
    %229 = arith.mulf %224, %228 : vector<2x8xf32>
    %230 = vector.broadcast %6 : vector<1x8xf32> to vector<2x8xf32>
    %231 = arith.mulf %229, %230 : vector<2x8xf32>
    %232 = vector.broadcast %7 : vector<1x8xf32> to vector<2x8xf32>
    %233 = arith.addf %231, %232 : vector<2x8xf32>
    %cst_81 = arith.constant 0.000000e+00 : f32
    %234 = vector.broadcast %cst_81 : f32 to vector<2x8xf32>
    %235 = arith.cmpf ogt, %233, %234 : vector<2x8xf32>
    %cst_82 = arith.constant 1.000000e-01 : f32
    %236 = vector.broadcast %cst_82 : f32 to vector<2x8xf32>
    %237 = arith.mulf %236, %233 : vector<2x8xf32>
    %238 = arith.select %235, %233, %237 : vector<2x8xi1>, vector<2x8xf32>
    %239 = vector.broadcast %174 : vector<2x1xf32> to vector<2x8xf32>
    %240 = arith.mulf %239, %238 : vector<2x8xf32>
    %241 = arith.addf %163, %240 : vector<2x8xf32>
    %c2_i32_83 = arith.constant 2 : i32
    %242 = arith.muli %c2_i32_61, %c2_i32_83 : i32
    %243 = arith.index_cast %242 : i32 to index
    %c0_84 = arith.constant 0 : index
    %244 = vector.load %arg11[%243, %c0_84] : memref<16x8xf32, #tpu.memory_space<vmem>>, vector<2x8xf32>
    tpu.vector_store %arg11[%243, %c0_84], %241 {strides = array<i32>} : memref<16x8xf32, #tpu.memory_space<vmem>>, vector<2x8xf32>,
    %c3_i32 = arith.constant 3 : i32
    %245 = arith.index_cast %c3_i32 : i32 to index
    %c0_85 = arith.constant 0 : index
    %c0_86 = arith.constant 0 : index
    %246 = vector.load %arg2[%245, %c0_85, %c0_86] : memref<9x2x1xf32, #tpu.memory_space<vmem>>, vector<1x2x1xf32>
    %247 = vector.shape_cast %246 : vector<1x2x1xf32> to vector<2x1xf32>
    %c1_i32_87 = arith.constant 1 : i32
    %248 = arith.addi %c3_i32, %c1_i32_87 : i32
    %249 = arith.index_cast %248 : i32 to index
    %c0_88 = arith.constant 0 : index
    %c0_89 = arith.constant 0 : index
    %250 = vector.load %arg2[%249, %c0_88, %c0_89] : memref<9x2x1xf32, #tpu.memory_space<vmem>>, vector<1x2x1xf32>
    %251 = vector.shape_cast %250 : vector<1x2x1xf32> to vector<2x1xf32>
    %252 = arith.subf %251, %247 : vector<2x1xf32>
    %cst_90 = arith.constant dense<0.000000e+00> : vector<2x32xf32>
    %253 = tpu.matmul %241, %8, %cst_90 {dimension_numbers = #tpu.dot_dimension_numbers<[1], [0], [0], [1], [0, 0, 1, 1], [], []>} : vector<2x8xf32>, vector<8x32xf32>, vector<2x32xf32> -> vector<2x32xf32>
    %254 = vector.broadcast %247 : vector<2x1xf32> to vector<2x32xf32>
    %255 = vector.broadcast %0 : vector<1x32xf32> to vector<2x32xf32>
    %256 = arith.mulf %254, %255 : vector<2x32xf32>
    %257 = arith.addf %253, %256 : vector<2x32xf32>
    %258 = vector.broadcast %1 : vector<1x32xf32> to vector<2x32xf32>
    %259 = arith.addf %257, %258 : vector<2x32xf32>
    %cst_91 = arith.constant dense<0.000000e+00> : vector<2xf32>
    %260 = vector.multi_reduction <add>, %259, %cst_91 [1] : vector<2x32xf32> to vector<2xf32>
    %261 = vector.shape_cast %260 : vector<2xf32> to vector<2x1xf32>
    %cst_92 = arith.constant 3.200000e+01 : f32
    %262 = vector.broadcast %cst_92 : f32 to vector<2x1xf32>
    %263 = arith.divf %261, %262 : vector<2x1xf32>
    %264 = vector.broadcast %263 : vector<2x1xf32> to vector<2x32xf32>
    %265 = arith.subf %259, %264 : vector<2x32xf32>
    %266 = arith.mulf %265, %265 : vector<2x32xf32>
    %cst_93 = arith.constant dense<0.000000e+00> : vector<2xf32>
    %267 = vector.multi_reduction <add>, %266, %cst_93 [1] : vector<2x32xf32> to vector<2xf32>
    %268 = vector.shape_cast %267 : vector<2xf32> to vector<2x1xf32>
    %cst_94 = arith.constant 3.200000e+01 : f32
    %269 = vector.broadcast %cst_94 : f32 to vector<2x1xf32>
    %270 = arith.divf %268, %269 : vector<2x1xf32>
    %271 = vector.broadcast %263 : vector<2x1xf32> to vector<2x32xf32>
    %272 = arith.subf %259, %271 : vector<2x32xf32>
    %cst_95 = arith.constant 9.99999974E-6 : f32
    %273 = vector.broadcast %cst_95 : f32 to vector<2x1xf32>
    %274 = arith.addf %270, %273 : vector<2x1xf32>
    %275 = math.rsqrt %274 : vector<2x1xf32>
    %276 = vector.broadcast %275 : vector<2x1xf32> to vector<2x32xf32>
    %277 = arith.mulf %272, %276 : vector<2x32xf32>
    %278 = vector.broadcast %2 : vector<1x32xf32> to vector<2x32xf32>
    %279 = arith.mulf %277, %278 : vector<2x32xf32>
    %280 = vector.broadcast %3 : vector<1x32xf32> to vector<2x32xf32>
    %281 = arith.addf %279, %280 : vector<2x32xf32>
    %cst_96 = arith.constant 0.000000e+00 : f32
    %282 = vector.broadcast %cst_96 : f32 to vector<2x32xf32>
    %283 = arith.cmpf ogt, %281, %282 : vector<2x32xf32>
    %cst_97 = arith.constant 1.000000e-01 : f32
    %284 = vector.broadcast %cst_97 : f32 to vector<2x32xf32>
    %285 = arith.mulf %284, %281 : vector<2x32xf32>
    %286 = arith.select %283, %281, %285 : vector<2x32xi1>, vector<2x32xf32>
    %cst_98 = arith.constant dense<0.000000e+00> : vector<2x8xf32>
    %287 = tpu.matmul %286, %9, %cst_98 {dimension_numbers = #tpu.dot_dimension_numbers<[1], [0], [0], [1], [0, 0, 1, 1], [], []>} : vector<2x32xf32>, vector<32x8xf32>, vector<2x8xf32> -> vector<2x8xf32>
    %288 = vector.broadcast %5 : vector<1x8xf32> to vector<2x8xf32>
    %289 = arith.addf %287, %288 : vector<2x8xf32>
    %cst_99 = arith.constant dense<0.000000e+00> : vector<2xf32>
    %290 = vector.multi_reduction <add>, %289, %cst_99 [1] : vector<2x8xf32> to vector<2xf32>
    %291 = vector.shape_cast %290 : vector<2xf32> to vector<2x1xf32>
    %cst_100 = arith.constant 8.000000e+00 : f32
    %292 = vector.broadcast %cst_100 : f32 to vector<2x1xf32>
    %293 = arith.divf %291, %292 : vector<2x1xf32>
    %294 = vector.broadcast %293 : vector<2x1xf32> to vector<2x8xf32>
    %295 = arith.subf %289, %294 : vector<2x8xf32>
    %296 = arith.mulf %295, %295 : vector<2x8xf32>
    %cst_101 = arith.constant dense<0.000000e+00> : vector<2xf32>
    %297 = vector.multi_reduction <add>, %296, %cst_101 [1] : vector<2x8xf32> to vector<2xf32>
    %298 = vector.shape_cast %297 : vector<2xf32> to vector<2x1xf32>
    %cst_102 = arith.constant 8.000000e+00 : f32
    %299 = vector.broadcast %cst_102 : f32 to vector<2x1xf32>
    %300 = arith.divf %298, %299 : vector<2x1xf32>
    %301 = vector.broadcast %293 : vector<2x1xf32> to vector<2x8xf32>
    %302 = arith.subf %289, %301 : vector<2x8xf32>
    %cst_103 = arith.constant 9.99999974E-6 : f32
    %303 = vector.broadcast %cst_103 : f32 to vector<2x1xf32>
    %304 = arith.addf %300, %303 : vector<2x1xf32>
    %305 = math.rsqrt %304 : vector<2x1xf32>
    %306 = vector.broadcast %305 : vector<2x1xf32> to vector<2x8xf32>
    %307 = arith.mulf %302, %306 : vector<2x8xf32>
    %308 = vector.broadcast %6 : vector<1x8xf32> to vector<2x8xf32>
    %309 = arith.mulf %307, %308 : vector<2x8xf32>
    %310 = vector.broadcast %7 : vector<1x8xf32> to vector<2x8xf32>
    %311 = arith.addf %309, %310 : vector<2x8xf32>
    %cst_104 = arith.constant 0.000000e+00 : f32
    %312 = vector.broadcast %cst_104 : f32 to vector<2x8xf32>
    %313 = arith.cmpf ogt, %311, %312 : vector<2x8xf32>
    %cst_105 = arith.constant 1.000000e-01 : f32
    %314 = vector.broadcast %cst_105 : f32 to vector<2x8xf32>
    %315 = arith.mulf %314, %311 : vector<2x8xf32>
    %316 = arith.select %313, %311, %315 : vector<2x8xi1>, vector<2x8xf32>
    %317 = vector.broadcast %252 : vector<2x1xf32> to vector<2x8xf32>
    %318 = arith.mulf %317, %316 : vector<2x8xf32>
    %319 = arith.addf %241, %318 : vector<2x8xf32>
    %c2_i32_106 = arith.constant 2 : i32
    %320 = arith.muli %c3_i32, %c2_i32_106 : i32
    %321 = arith.index_cast %320 : i32 to index
    %c0_107 = arith.constant 0 : index
    %322 = vector.load %arg11[%321, %c0_107] : memref<16x8xf32, #tpu.memory_space<vmem>>, vector<2x8xf32>
    tpu.vector_store %arg11[%321, %c0_107], %319 {strides = array<i32>} : memref<16x8xf32, #tpu.memory_space<vmem>>, vector<2x8xf32>,
    %c4_i32 = arith.constant 4 : i32
    %323 = arith.index_cast %c4_i32 : i32 to index
    %c0_108 = arith.constant 0 : index
    %c0_109 = arith.constant 0 : index
    %324 = vector.load %arg2[%323, %c0_108, %c0_109] : memref<9x2x1xf32, #tpu.memory_space<vmem>>, vector<1x2x1xf32>
    %325 = vector.shape_cast %324 : vector<1x2x1xf32> to vector<2x1xf32>
    %c1_i32_110 = arith.constant 1 : i32
    %326 = arith.addi %c4_i32, %c1_i32_110 : i32
    %327 = arith.index_cast %326 : i32 to index
    %c0_111 = arith.constant 0 : index
    %c0_112 = arith.constant 0 : index
    %328 = vector.load %arg2[%327, %c0_111, %c0_112] : memref<9x2x1xf32, #tpu.memory_space<vmem>>, vector<1x2x1xf32>
    %329 = vector.shape_cast %328 : vector<1x2x1xf32> to vector<2x1xf32>
    %330 = arith.subf %329, %325 : vector<2x1xf32>
    %cst_113 = arith.constant dense<0.000000e+00> : vector<2x32xf32>
    %331 = tpu.matmul %319, %8, %cst_113 {dimension_numbers = #tpu.dot_dimension_numbers<[1], [0], [0], [1], [0, 0, 1, 1], [], []>} : vector<2x8xf32>, vector<8x32xf32>, vector<2x32xf32> -> vector<2x32xf32>
    %332 = vector.broadcast %325 : vector<2x1xf32> to vector<2x32xf32>
    %333 = vector.broadcast %0 : vector<1x32xf32> to vector<2x32xf32>
    %334 = arith.mulf %332, %333 : vector<2x32xf32>
    %335 = arith.addf %331, %334 : vector<2x32xf32>
    %336 = vector.broadcast %1 : vector<1x32xf32> to vector<2x32xf32>
    %337 = arith.addf %335, %336 : vector<2x32xf32>
    %cst_114 = arith.constant dense<0.000000e+00> : vector<2xf32>
    %338 = vector.multi_reduction <add>, %337, %cst_114 [1] : vector<2x32xf32> to vector<2xf32>
    %339 = vector.shape_cast %338 : vector<2xf32> to vector<2x1xf32>
    %cst_115 = arith.constant 3.200000e+01 : f32
    %340 = vector.broadcast %cst_115 : f32 to vector<2x1xf32>
    %341 = arith.divf %339, %340 : vector<2x1xf32>
    %342 = vector.broadcast %341 : vector<2x1xf32> to vector<2x32xf32>
    %343 = arith.subf %337, %342 : vector<2x32xf32>
    %344 = arith.mulf %343, %343 : vector<2x32xf32>
    %cst_116 = arith.constant dense<0.000000e+00> : vector<2xf32>
    %345 = vector.multi_reduction <add>, %344, %cst_116 [1] : vector<2x32xf32> to vector<2xf32>
    %346 = vector.shape_cast %345 : vector<2xf32> to vector<2x1xf32>
    %cst_117 = arith.constant 3.200000e+01 : f32
    %347 = vector.broadcast %cst_117 : f32 to vector<2x1xf32>
    %348 = arith.divf %346, %347 : vector<2x1xf32>
    %349 = vector.broadcast %341 : vector<2x1xf32> to vector<2x32xf32>
    %350 = arith.subf %337, %349 : vector<2x32xf32>
    %cst_118 = arith.constant 9.99999974E-6 : f32
    %351 = vector.broadcast %cst_118 : f32 to vector<2x1xf32>
    %352 = arith.addf %348, %351 : vector<2x1xf32>
    %353 = math.rsqrt %352 : vector<2x1xf32>
    %354 = vector.broadcast %353 : vector<2x1xf32> to vector<2x32xf32>
    %355 = arith.mulf %350, %354 : vector<2x32xf32>
    %356 = vector.broadcast %2 : vector<1x32xf32> to vector<2x32xf32>
    %357 = arith.mulf %355, %356 : vector<2x32xf32>
    %358 = vector.broadcast %3 : vector<1x32xf32> to vector<2x32xf32>
    %359 = arith.addf %357, %358 : vector<2x32xf32>
    %cst_119 = arith.constant 0.000000e+00 : f32
    %360 = vector.broadcast %cst_119 : f32 to vector<2x32xf32>
    %361 = arith.cmpf ogt, %359, %360 : vector<2x32xf32>
    %cst_120 = arith.constant 1.000000e-01 : f32
    %362 = vector.broadcast %cst_120 : f32 to vector<2x32xf32>
    %363 = arith.mulf %362, %359 : vector<2x32xf32>
    %364 = arith.select %361, %359, %363 : vector<2x32xi1>, vector<2x32xf32>
    %cst_121 = arith.constant dense<0.000000e+00> : vector<2x8xf32>
    %365 = tpu.matmul %364, %9, %cst_121 {dimension_numbers = #tpu.dot_dimension_numbers<[1], [0], [0], [1], [0, 0, 1, 1], [], []>} : vector<2x32xf32>, vector<32x8xf32>, vector<2x8xf32> -> vector<2x8xf32>
    %366 = vector.broadcast %5 : vector<1x8xf32> to vector<2x8xf32>
    %367 = arith.addf %365, %366 : vector<2x8xf32>
    %cst_122 = arith.constant dense<0.000000e+00> : vector<2xf32>
    %368 = vector.multi_reduction <add>, %367, %cst_122 [1] : vector<2x8xf32> to vector<2xf32>
    %369 = vector.shape_cast %368 : vector<2xf32> to vector<2x1xf32>
    %cst_123 = arith.constant 8.000000e+00 : f32
    %370 = vector.broadcast %cst_123 : f32 to vector<2x1xf32>
    %371 = arith.divf %369, %370 : vector<2x1xf32>
    %372 = vector.broadcast %371 : vector<2x1xf32> to vector<2x8xf32>
    %373 = arith.subf %367, %372 : vector<2x8xf32>
    %374 = arith.mulf %373, %373 : vector<2x8xf32>
    %cst_124 = arith.constant dense<0.000000e+00> : vector<2xf32>
    %375 = vector.multi_reduction <add>, %374, %cst_124 [1] : vector<2x8xf32> to vector<2xf32>
    %376 = vector.shape_cast %375 : vector<2xf32> to vector<2x1xf32>
    %cst_125 = arith.constant 8.000000e+00 : f32
    %377 = vector.broadcast %cst_125 : f32 to vector<2x1xf32>
    %378 = arith.divf %376, %377 : vector<2x1xf32>
    %379 = vector.broadcast %371 : vector<2x1xf32> to vector<2x8xf32>
    %380 = arith.subf %367, %379 : vector<2x8xf32>
    %cst_126 = arith.constant 9.99999974E-6 : f32
    %381 = vector.broadcast %cst_126 : f32 to vector<2x1xf32>
    %382 = arith.addf %378, %381 : vector<2x1xf32>
    %383 = math.rsqrt %382 : vector<2x1xf32>
    %384 = vector.broadcast %383 : vector<2x1xf32> to vector<2x8xf32>
    %385 = arith.mulf %380, %384 : vector<2x8xf32>
    %386 = vector.broadcast %6 : vector<1x8xf32> to vector<2x8xf32>
    %387 = arith.mulf %385, %386 : vector<2x8xf32>
    %388 = vector.broadcast %7 : vector<1x8xf32> to vector<2x8xf32>
    %389 = arith.addf %387, %388 : vector<2x8xf32>
    %cst_127 = arith.constant 0.000000e+00 : f32
    %390 = vector.broadcast %cst_127 : f32 to vector<2x8xf32>
    %391 = arith.cmpf ogt, %389, %390 : vector<2x8xf32>
    %cst_128 = arith.constant 1.000000e-01 : f32
    %392 = vector.broadcast %cst_128 : f32 to vector<2x8xf32>
    %393 = arith.mulf %392, %389 : vector<2x8xf32>
    %394 = arith.select %391, %389, %393 : vector<2x8xi1>, vector<2x8xf32>
    %395 = vector.broadcast %330 : vector<2x1xf32> to vector<2x8xf32>
    %396 = arith.mulf %395, %394 : vector<2x8xf32>
    %397 = arith.addf %319, %396 : vector<2x8xf32>
    %c2_i32_129 = arith.constant 2 : i32
    %398 = arith.muli %c4_i32, %c2_i32_129 : i32
    %399 = arith.index_cast %398 : i32 to index
    %c0_130 = arith.constant 0 : index
    %400 = vector.load %arg11[%399, %c0_130] : memref<16x8xf32, #tpu.memory_space<vmem>>, vector<2x8xf32>
    tpu.vector_store %arg11[%399, %c0_130], %397 {strides = array<i32>} : memref<16x8xf32, #tpu.memory_space<vmem>>, vector<2x8xf32>,
    %c5_i32 = arith.constant 5 : i32
    %401 = arith.index_cast %c5_i32 : i32 to index
    %c0_131 = arith.constant 0 : index
    %c0_132 = arith.constant 0 : index
    %402 = vector.load %arg2[%401, %c0_131, %c0_132] : memref<9x2x1xf32, #tpu.memory_space<vmem>>, vector<1x2x1xf32>
    %403 = vector.shape_cast %402 : vector<1x2x1xf32> to vector<2x1xf32>
    %c1_i32_133 = arith.constant 1 : i32
    %404 = arith.addi %c5_i32, %c1_i32_133 : i32
    %405 = arith.index_cast %404 : i32 to index
    %c0_134 = arith.constant 0 : index
    %c0_135 = arith.constant 0 : index
    %406 = vector.load %arg2[%405, %c0_134, %c0_135] : memref<9x2x1xf32, #tpu.memory_space<vmem>>, vector<1x2x1xf32>
    %407 = vector.shape_cast %406 : vector<1x2x1xf32> to vector<2x1xf32>
    %408 = arith.subf %407, %403 : vector<2x1xf32>
    %cst_136 = arith.constant dense<0.000000e+00> : vector<2x32xf32>
    %409 = tpu.matmul %397, %8, %cst_136 {dimension_numbers = #tpu.dot_dimension_numbers<[1], [0], [0], [1], [0, 0, 1, 1], [], []>} : vector<2x8xf32>, vector<8x32xf32>, vector<2x32xf32> -> vector<2x32xf32>
    %410 = vector.broadcast %403 : vector<2x1xf32> to vector<2x32xf32>
    %411 = vector.broadcast %0 : vector<1x32xf32> to vector<2x32xf32>
    %412 = arith.mulf %410, %411 : vector<2x32xf32>
    %413 = arith.addf %409, %412 : vector<2x32xf32>
    %414 = vector.broadcast %1 : vector<1x32xf32> to vector<2x32xf32>
    %415 = arith.addf %413, %414 : vector<2x32xf32>
    %cst_137 = arith.constant dense<0.000000e+00> : vector<2xf32>
    %416 = vector.multi_reduction <add>, %415, %cst_137 [1] : vector<2x32xf32> to vector<2xf32>
    %417 = vector.shape_cast %416 : vector<2xf32> to vector<2x1xf32>
    %cst_138 = arith.constant 3.200000e+01 : f32
    %418 = vector.broadcast %cst_138 : f32 to vector<2x1xf32>
    %419 = arith.divf %417, %418 : vector<2x1xf32>
    %420 = vector.broadcast %419 : vector<2x1xf32> to vector<2x32xf32>
    %421 = arith.subf %415, %420 : vector<2x32xf32>
    %422 = arith.mulf %421, %421 : vector<2x32xf32>
    %cst_139 = arith.constant dense<0.000000e+00> : vector<2xf32>
    %423 = vector.multi_reduction <add>, %422, %cst_139 [1] : vector<2x32xf32> to vector<2xf32>
    %424 = vector.shape_cast %423 : vector<2xf32> to vector<2x1xf32>
    %cst_140 = arith.constant 3.200000e+01 : f32
    %425 = vector.broadcast %cst_140 : f32 to vector<2x1xf32>
    %426 = arith.divf %424, %425 : vector<2x1xf32>
    %427 = vector.broadcast %419 : vector<2x1xf32> to vector<2x32xf32>
    %428 = arith.subf %415, %427 : vector<2x32xf32>
    %cst_141 = arith.constant 9.99999974E-6 : f32
    %429 = vector.broadcast %cst_141 : f32 to vector<2x1xf32>
    %430 = arith.addf %426, %429 : vector<2x1xf32>
    %431 = math.rsqrt %430 : vector<2x1xf32>
    %432 = vector.broadcast %431 : vector<2x1xf32> to vector<2x32xf32>
    %433 = arith.mulf %428, %432 : vector<2x32xf32>
    %434 = vector.broadcast %2 : vector<1x32xf32> to vector<2x32xf32>
    %435 = arith.mulf %433, %434 : vector<2x32xf32>
    %436 = vector.broadcast %3 : vector<1x32xf32> to vector<2x32xf32>
    %437 = arith.addf %435, %436 : vector<2x32xf32>
    %cst_142 = arith.constant 0.000000e+00 : f32
    %438 = vector.broadcast %cst_142 : f32 to vector<2x32xf32>
    %439 = arith.cmpf ogt, %437, %438 : vector<2x32xf32>
    %cst_143 = arith.constant 1.000000e-01 : f32
    %440 = vector.broadcast %cst_143 : f32 to vector<2x32xf32>
    %441 = arith.mulf %440, %437 : vector<2x32xf32>
    %442 = arith.select %439, %437, %441 : vector<2x32xi1>, vector<2x32xf32>
    %cst_144 = arith.constant dense<0.000000e+00> : vector<2x8xf32>
    %443 = tpu.matmul %442, %9, %cst_144 {dimension_numbers = #tpu.dot_dimension_numbers<[1], [0], [0], [1], [0, 0, 1, 1], [], []>} : vector<2x32xf32>, vector<32x8xf32>, vector<2x8xf32> -> vector<2x8xf32>
    %444 = vector.broadcast %5 : vector<1x8xf32> to vector<2x8xf32>
    %445 = arith.addf %443, %444 : vector<2x8xf32>
    %cst_145 = arith.constant dense<0.000000e+00> : vector<2xf32>
    %446 = vector.multi_reduction <add>, %445, %cst_145 [1] : vector<2x8xf32> to vector<2xf32>
    %447 = vector.shape_cast %446 : vector<2xf32> to vector<2x1xf32>
    %cst_146 = arith.constant 8.000000e+00 : f32
    %448 = vector.broadcast %cst_146 : f32 to vector<2x1xf32>
    %449 = arith.divf %447, %448 : vector<2x1xf32>
    %450 = vector.broadcast %449 : vector<2x1xf32> to vector<2x8xf32>
    %451 = arith.subf %445, %450 : vector<2x8xf32>
    %452 = arith.mulf %451, %451 : vector<2x8xf32>
    %cst_147 = arith.constant dense<0.000000e+00> : vector<2xf32>
    %453 = vector.multi_reduction <add>, %452, %cst_147 [1] : vector<2x8xf32> to vector<2xf32>
    %454 = vector.shape_cast %453 : vector<2xf32> to vector<2x1xf32>
    %cst_148 = arith.constant 8.000000e+00 : f32
    %455 = vector.broadcast %cst_148 : f32 to vector<2x1xf32>
    %456 = arith.divf %454, %455 : vector<2x1xf32>
    %457 = vector.broadcast %449 : vector<2x1xf32> to vector<2x8xf32>
    %458 = arith.subf %445, %457 : vector<2x8xf32>
    %cst_149 = arith.constant 9.99999974E-6 : f32
    %459 = vector.broadcast %cst_149 : f32 to vector<2x1xf32>
    %460 = arith.addf %456, %459 : vector<2x1xf32>
    %461 = math.rsqrt %460 : vector<2x1xf32>
    %462 = vector.broadcast %461 : vector<2x1xf32> to vector<2x8xf32>
    %463 = arith.mulf %458, %462 : vector<2x8xf32>
    %464 = vector.broadcast %6 : vector<1x8xf32> to vector<2x8xf32>
    %465 = arith.mulf %463, %464 : vector<2x8xf32>
    %466 = vector.broadcast %7 : vector<1x8xf32> to vector<2x8xf32>
    %467 = arith.addf %465, %466 : vector<2x8xf32>
    %cst_150 = arith.constant 0.000000e+00 : f32
    %468 = vector.broadcast %cst_150 : f32 to vector<2x8xf32>
    %469 = arith.cmpf ogt, %467, %468 : vector<2x8xf32>
    %cst_151 = arith.constant 1.000000e-01 : f32
    %470 = vector.broadcast %cst_151 : f32 to vector<2x8xf32>
    %471 = arith.mulf %470, %467 : vector<2x8xf32>
    %472 = arith.select %469, %467, %471 : vector<2x8xi1>, vector<2x8xf32>
    %473 = vector.broadcast %408 : vector<2x1xf32> to vector<2x8xf32>
    %474 = arith.mulf %473, %472 : vector<2x8xf32>
    %475 = arith.addf %397, %474 : vector<2x8xf32>
    %c2_i32_152 = arith.constant 2 : i32
    %476 = arith.muli %c5_i32, %c2_i32_152 : i32
    %477 = arith.index_cast %476 : i32 to index
    %c0_153 = arith.constant 0 : index
    %478 = vector.load %arg11[%477, %c0_153] : memref<16x8xf32, #tpu.memory_space<vmem>>, vector<2x8xf32>
    tpu.vector_store %arg11[%477, %c0_153], %475 {strides = array<i32>} : memref<16x8xf32, #tpu.memory_space<vmem>>, vector<2x8xf32>,
    %c6_i32 = arith.constant 6 : i32
    %479 = arith.index_cast %c6_i32 : i32 to index
    %c0_154 = arith.constant 0 : index
    %c0_155 = arith.constant 0 : index
    %480 = vector.load %arg2[%479, %c0_154, %c0_155] : memref<9x2x1xf32, #tpu.memory_space<vmem>>, vector<1x2x1xf32>
    %481 = vector.shape_cast %480 : vector<1x2x1xf32> to vector<2x1xf32>
    %c1_i32_156 = arith.constant 1 : i32
    %482 = arith.addi %c6_i32, %c1_i32_156 : i32
    %483 = arith.index_cast %482 : i32 to index
    %c0_157 = arith.constant 0 : index
    %c0_158 = arith.constant 0 : index
    %484 = vector.load %arg2[%483, %c0_157, %c0_158] : memref<9x2x1xf32, #tpu.memory_space<vmem>>, vector<1x2x1xf32>
    %485 = vector.shape_cast %484 : vector<1x2x1xf32> to vector<2x1xf32>
    %486 = arith.subf %485, %481 : vector<2x1xf32>
    %cst_159 = arith.constant dense<0.000000e+00> : vector<2x32xf32>
    %487 = tpu.matmul %475, %8, %cst_159 {dimension_numbers = #tpu.dot_dimension_numbers<[1], [0], [0], [1], [0, 0, 1, 1], [], []>} : vector<2x8xf32>, vector<8x32xf32>, vector<2x32xf32> -> vector<2x32xf32>
    %488 = vector.broadcast %481 : vector<2x1xf32> to vector<2x32xf32>
    %489 = vector.broadcast %0 : vector<1x32xf32> to vector<2x32xf32>
    %490 = arith.mulf %488, %489 : vector<2x32xf32>
    %491 = arith.addf %487, %490 : vector<2x32xf32>
    %492 = vector.broadcast %1 : vector<1x32xf32> to vector<2x32xf32>
    %493 = arith.addf %491, %492 : vector<2x32xf32>
    %cst_160 = arith.constant dense<0.000000e+00> : vector<2xf32>
    %494 = vector.multi_reduction <add>, %493, %cst_160 [1] : vector<2x32xf32> to vector<2xf32>
    %495 = vector.shape_cast %494 : vector<2xf32> to vector<2x1xf32>
    %cst_161 = arith.constant 3.200000e+01 : f32
    %496 = vector.broadcast %cst_161 : f32 to vector<2x1xf32>
    %497 = arith.divf %495, %496 : vector<2x1xf32>
    %498 = vector.broadcast %497 : vector<2x1xf32> to vector<2x32xf32>
    %499 = arith.subf %493, %498 : vector<2x32xf32>
    %500 = arith.mulf %499, %499 : vector<2x32xf32>
    %cst_162 = arith.constant dense<0.000000e+00> : vector<2xf32>
    %501 = vector.multi_reduction <add>, %500, %cst_162 [1] : vector<2x32xf32> to vector<2xf32>
    %502 = vector.shape_cast %501 : vector<2xf32> to vector<2x1xf32>
    %cst_163 = arith.constant 3.200000e+01 : f32
    %503 = vector.broadcast %cst_163 : f32 to vector<2x1xf32>
    %504 = arith.divf %502, %503 : vector<2x1xf32>
    %505 = vector.broadcast %497 : vector<2x1xf32> to vector<2x32xf32>
    %506 = arith.subf %493, %505 : vector<2x32xf32>
    %cst_164 = arith.constant 9.99999974E-6 : f32
    %507 = vector.broadcast %cst_164 : f32 to vector<2x1xf32>
    %508 = arith.addf %504, %507 : vector<2x1xf32>
    %509 = math.rsqrt %508 : vector<2x1xf32>
    %510 = vector.broadcast %509 : vector<2x1xf32> to vector<2x32xf32>
    %511 = arith.mulf %506, %510 : vector<2x32xf32>
    %512 = vector.broadcast %2 : vector<1x32xf32> to vector<2x32xf32>
    %513 = arith.mulf %511, %512 : vector<2x32xf32>
    %514 = vector.broadcast %3 : vector<1x32xf32> to vector<2x32xf32>
    %515 = arith.addf %513, %514 : vector<2x32xf32>
    %cst_165 = arith.constant 0.000000e+00 : f32
    %516 = vector.broadcast %cst_165 : f32 to vector<2x32xf32>
    %517 = arith.cmpf ogt, %515, %516 : vector<2x32xf32>
    %cst_166 = arith.constant 1.000000e-01 : f32
    %518 = vector.broadcast %cst_166 : f32 to vector<2x32xf32>
    %519 = arith.mulf %518, %515 : vector<2x32xf32>
    %520 = arith.select %517, %515, %519 : vector<2x32xi1>, vector<2x32xf32>
    %cst_167 = arith.constant dense<0.000000e+00> : vector<2x8xf32>
    %521 = tpu.matmul %520, %9, %cst_167 {dimension_numbers = #tpu.dot_dimension_numbers<[1], [0], [0], [1], [0, 0, 1, 1], [], []>} : vector<2x32xf32>, vector<32x8xf32>, vector<2x8xf32> -> vector<2x8xf32>
    %522 = vector.broadcast %5 : vector<1x8xf32> to vector<2x8xf32>
    %523 = arith.addf %521, %522 : vector<2x8xf32>
    %cst_168 = arith.constant dense<0.000000e+00> : vector<2xf32>
    %524 = vector.multi_reduction <add>, %523, %cst_168 [1] : vector<2x8xf32> to vector<2xf32>
    %525 = vector.shape_cast %524 : vector<2xf32> to vector<2x1xf32>
    %cst_169 = arith.constant 8.000000e+00 : f32
    %526 = vector.broadcast %cst_169 : f32 to vector<2x1xf32>
    %527 = arith.divf %525, %526 : vector<2x1xf32>
    %528 = vector.broadcast %527 : vector<2x1xf32> to vector<2x8xf32>
    %529 = arith.subf %523, %528 : vector<2x8xf32>
    %530 = arith.mulf %529, %529 : vector<2x8xf32>
    %cst_170 = arith.constant dense<0.000000e+00> : vector<2xf32>
    %531 = vector.multi_reduction <add>, %530, %cst_170 [1] : vector<2x8xf32> to vector<2xf32>
    %532 = vector.shape_cast %531 : vector<2xf32> to vector<2x1xf32>
    %cst_171 = arith.constant 8.000000e+00 : f32
    %533 = vector.broadcast %cst_171 : f32 to vector<2x1xf32>
    %534 = arith.divf %532, %533 : vector<2x1xf32>
    %535 = vector.broadcast %527 : vector<2x1xf32> to vector<2x8xf32>
    %536 = arith.subf %523, %535 : vector<2x8xf32>
    %cst_172 = arith.constant 9.99999974E-6 : f32
    %537 = vector.broadcast %cst_172 : f32 to vector<2x1xf32>
    %538 = arith.addf %534, %537 : vector<2x1xf32>
    %539 = math.rsqrt %538 : vector<2x1xf32>
    %540 = vector.broadcast %539 : vector<2x1xf32> to vector<2x8xf32>
    %541 = arith.mulf %536, %540 : vector<2x8xf32>
    %542 = vector.broadcast %6 : vector<1x8xf32> to vector<2x8xf32>
    %543 = arith.mulf %541, %542 : vector<2x8xf32>
    %544 = vector.broadcast %7 : vector<1x8xf32> to vector<2x8xf32>
    %545 = arith.addf %543, %544 : vector<2x8xf32>
    %cst_173 = arith.constant 0.000000e+00 : f32
    %546 = vector.broadcast %cst_173 : f32 to vector<2x8xf32>
    %547 = arith.cmpf ogt, %545, %546 : vector<2x8xf32>
    %cst_174 = arith.constant 1.000000e-01 : f32
    %548 = vector.broadcast %cst_174 : f32 to vector<2x8xf32>
    %549 = arith.mulf %548, %545 : vector<2x8xf32>
    %550 = arith.select %547, %545, %549 : vector<2x8xi1>, vector<2x8xf32>
    %551 = vector.broadcast %486 : vector<2x1xf32> to vector<2x8xf32>
    %552 = arith.mulf %551, %550 : vector<2x8xf32>
    %553 = arith.addf %475, %552 : vector<2x8xf32>
    %c2_i32_175 = arith.constant 2 : i32
    %554 = arith.muli %c6_i32, %c2_i32_175 : i32
    %555 = arith.index_cast %554 : i32 to index
    %c0_176 = arith.constant 0 : index
    %556 = vector.load %arg11[%555, %c0_176] : memref<16x8xf32, #tpu.memory_space<vmem>>, vector<2x8xf32>
    tpu.vector_store %arg11[%555, %c0_176], %553 {strides = array<i32>} : memref<16x8xf32, #tpu.memory_space<vmem>>, vector<2x8xf32>,
    %c7_i32 = arith.constant 7 : i32
    %557 = arith.index_cast %c7_i32 : i32 to index
    %c0_177 = arith.constant 0 : index
    %c0_178 = arith.constant 0 : index
    %558 = vector.load %arg2[%557, %c0_177, %c0_178] : memref<9x2x1xf32, #tpu.memory_space<vmem>>, vector<1x2x1xf32>
    %559 = vector.shape_cast %558 : vector<1x2x1xf32> to vector<2x1xf32>
    %c1_i32_179 = arith.constant 1 : i32
    %560 = arith.addi %c7_i32, %c1_i32_179 : i32
    %561 = arith.index_cast %560 : i32 to index
    %c0_180 = arith.constant 0 : index
    %c0_181 = arith.constant 0 : index
    %562 = vector.load %arg2[%561, %c0_180, %c0_181] : memref<9x2x1xf32, #tpu.memory_space<vmem>>, vector<1x2x1xf32>
    %563 = vector.shape_cast %562 : vector<1x2x1xf32> to vector<2x1xf32>
    %564 = arith.subf %563, %559 : vector<2x1xf32>
    %cst_182 = arith.constant dense<0.000000e+00> : vector<2x32xf32>
    %565 = tpu.matmul %553, %8, %cst_182 {dimension_numbers = #tpu.dot_dimension_numbers<[1], [0], [0], [1], [0, 0, 1, 1], [], []>} : vector<2x8xf32>, vector<8x32xf32>, vector<2x32xf32> -> vector<2x32xf32>
    %566 = vector.broadcast %559 : vector<2x1xf32> to vector<2x32xf32>
    %567 = vector.broadcast %0 : vector<1x32xf32> to vector<2x32xf32>
    %568 = arith.mulf %566, %567 : vector<2x32xf32>
    %569 = arith.addf %565, %568 : vector<2x32xf32>
    %570 = vector.broadcast %1 : vector<1x32xf32> to vector<2x32xf32>
    %571 = arith.addf %569, %570 : vector<2x32xf32>
    %cst_183 = arith.constant dense<0.000000e+00> : vector<2xf32>
    %572 = vector.multi_reduction <add>, %571, %cst_183 [1] : vector<2x32xf32> to vector<2xf32>
    %573 = vector.shape_cast %572 : vector<2xf32> to vector<2x1xf32>
    %cst_184 = arith.constant 3.200000e+01 : f32
    %574 = vector.broadcast %cst_184 : f32 to vector<2x1xf32>
    %575 = arith.divf %573, %574 : vector<2x1xf32>
    %576 = vector.broadcast %575 : vector<2x1xf32> to vector<2x32xf32>
    %577 = arith.subf %571, %576 : vector<2x32xf32>
    %578 = arith.mulf %577, %577 : vector<2x32xf32>
    %cst_185 = arith.constant dense<0.000000e+00> : vector<2xf32>
    %579 = vector.multi_reduction <add>, %578, %cst_185 [1] : vector<2x32xf32> to vector<2xf32>
    %580 = vector.shape_cast %579 : vector<2xf32> to vector<2x1xf32>
    %cst_186 = arith.constant 3.200000e+01 : f32
    %581 = vector.broadcast %cst_186 : f32 to vector<2x1xf32>
    %582 = arith.divf %580, %581 : vector<2x1xf32>
    %583 = vector.broadcast %575 : vector<2x1xf32> to vector<2x32xf32>
    %584 = arith.subf %571, %583 : vector<2x32xf32>
    %cst_187 = arith.constant 9.99999974E-6 : f32
    %585 = vector.broadcast %cst_187 : f32 to vector<2x1xf32>
    %586 = arith.addf %582, %585 : vector<2x1xf32>
    %587 = math.rsqrt %586 : vector<2x1xf32>
    %588 = vector.broadcast %587 : vector<2x1xf32> to vector<2x32xf32>
    %589 = arith.mulf %584, %588 : vector<2x32xf32>
    %590 = vector.broadcast %2 : vector<1x32xf32> to vector<2x32xf32>
    %591 = arith.mulf %589, %590 : vector<2x32xf32>
    %592 = vector.broadcast %3 : vector<1x32xf32> to vector<2x32xf32>
    %593 = arith.addf %591, %592 : vector<2x32xf32>
    %cst_188 = arith.constant 0.000000e+00 : f32
    %594 = vector.broadcast %cst_188 : f32 to vector<2x32xf32>
    %595 = arith.cmpf ogt, %593, %594 : vector<2x32xf32>
    %cst_189 = arith.constant 1.000000e-01 : f32
    %596 = vector.broadcast %cst_189 : f32 to vector<2x32xf32>
    %597 = arith.mulf %596, %593 : vector<2x32xf32>
    %598 = arith.select %595, %593, %597 : vector<2x32xi1>, vector<2x32xf32>
    %cst_190 = arith.constant dense<0.000000e+00> : vector<2x8xf32>
    %599 = tpu.matmul %598, %9, %cst_190 {dimension_numbers = #tpu.dot_dimension_numbers<[1], [0], [0], [1], [0, 0, 1, 1], [], []>} : vector<2x32xf32>, vector<32x8xf32>, vector<2x8xf32> -> vector<2x8xf32>
    %600 = vector.broadcast %5 : vector<1x8xf32> to vector<2x8xf32>
    %601 = arith.addf %599, %600 : vector<2x8xf32>
    %cst_191 = arith.constant dense<0.000000e+00> : vector<2xf32>
    %602 = vector.multi_reduction <add>, %601, %cst_191 [1] : vector<2x8xf32> to vector<2xf32>
    %603 = vector.shape_cast %602 : vector<2xf32> to vector<2x1xf32>
    %cst_192 = arith.constant 8.000000e+00 : f32
    %604 = vector.broadcast %cst_192 : f32 to vector<2x1xf32>
    %605 = arith.divf %603, %604 : vector<2x1xf32>
    %606 = vector.broadcast %605 : vector<2x1xf32> to vector<2x8xf32>
    %607 = arith.subf %601, %606 : vector<2x8xf32>
    %608 = arith.mulf %607, %607 : vector<2x8xf32>
    %cst_193 = arith.constant dense<0.000000e+00> : vector<2xf32>
    %609 = vector.multi_reduction <add>, %608, %cst_193 [1] : vector<2x8xf32> to vector<2xf32>
    %610 = vector.shape_cast %609 : vector<2xf32> to vector<2x1xf32>
    %cst_194 = arith.constant 8.000000e+00 : f32
    %611 = vector.broadcast %cst_194 : f32 to vector<2x1xf32>
    %612 = arith.divf %610, %611 : vector<2x1xf32>
    %613 = vector.broadcast %605 : vector<2x1xf32> to vector<2x8xf32>
    %614 = arith.subf %601, %613 : vector<2x8xf32>
    %cst_195 = arith.constant 9.99999974E-6 : f32
    %615 = vector.broadcast %cst_195 : f32 to vector<2x1xf32>
    %616 = arith.addf %612, %615 : vector<2x1xf32>
    %617 = math.rsqrt %616 : vector<2x1xf32>
    %618 = vector.broadcast %617 : vector<2x1xf32> to vector<2x8xf32>
    %619 = arith.mulf %614, %618 : vector<2x8xf32>
    %620 = vector.broadcast %6 : vector<1x8xf32> to vector<2x8xf32>
    %621 = arith.mulf %619, %620 : vector<2x8xf32>
    %622 = vector.broadcast %7 : vector<1x8xf32> to vector<2x8xf32>
    %623 = arith.addf %621, %622 : vector<2x8xf32>
    %cst_196 = arith.constant 0.000000e+00 : f32
    %624 = vector.broadcast %cst_196 : f32 to vector<2x8xf32>
    %625 = arith.cmpf ogt, %623, %624 : vector<2x8xf32>
    %cst_197 = arith.constant 1.000000e-01 : f32
    %626 = vector.broadcast %cst_197 : f32 to vector<2x8xf32>
    %627 = arith.mulf %626, %623 : vector<2x8xf32>
    %628 = arith.select %625, %623, %627 : vector<2x8xi1>, vector<2x8xf32>
    %629 = vector.broadcast %564 : vector<2x1xf32> to vector<2x8xf32>
    %630 = arith.mulf %629, %628 : vector<2x8xf32>
    %631 = arith.addf %553, %630 : vector<2x8xf32>
    %c2_i32_198 = arith.constant 2 : i32
    %632 = arith.muli %c7_i32, %c2_i32_198 : i32
    %633 = arith.index_cast %632 : i32 to index
    %c0_199 = arith.constant 0 : index
    %634 = vector.load %arg11[%633, %c0_199] : memref<16x8xf32, #tpu.memory_space<vmem>>, vector<2x8xf32>
    tpu.vector_store %arg11[%633, %c0_199], %631 {strides = array<i32>} : memref<16x8xf32, #tpu.memory_space<vmem>>, vector<2x8xf32>,
    %c8_i32 = arith.constant 8 : i32
    %c0_200 = arith.constant 0 : index
    %c0_201 = arith.constant 0 : index
    %635 = vector.load %arg11[%c0_200, %c0_201] : memref<16x8xf32, #tpu.memory_space<vmem>>, vector<16x8xf32>
    %c0_202 = arith.constant 0 : index
    %c0_203 = arith.constant 0 : index
    %636 = vector.load %arg7[%c0_202, %c0_203] : memref<8x32xf32, #tpu.memory_space<vmem>>, vector<8x32xf32>
    %cst_204 = arith.constant dense<0.000000e+00> : vector<16x32xf32>
    %637 = tpu.matmul %635, %636, %cst_204 {dimension_numbers = #tpu.dot_dimension_numbers<[1], [0], [0], [1], [0, 0, 1, 1], [], []>} : vector<16x8xf32>, vector<8x32xf32>, vector<16x32xf32> -> vector<16x32xf32>
    %638 = vector.broadcast %4 : vector<1x32xf32> to vector<16x32xf32>
    %639 = arith.addf %637, %638 : vector<16x32xf32>
    %cst_205 = arith.constant 0.000000e+00 : f32
    %640 = vector.broadcast %cst_205 : f32 to vector<16x32xf32>
    %641 = arith.cmpf ogt, %639, %640 : vector<16x32xf32>
    %cst_206 = arith.constant 1.000000e-01 : f32
    %642 = vector.broadcast %cst_206 : f32 to vector<16x32xf32>
    %643 = arith.mulf %642, %639 : vector<16x32xf32>
    %644 = arith.select %641, %639, %643 : vector<16x32xi1>, vector<16x32xf32>
    %c0_207 = arith.constant 0 : index
    %c0_208 = arith.constant 0 : index
    %645 = vector.load %arg8[%c0_207, %c0_208] : memref<32x4xf32, #tpu.memory_space<vmem>>, vector<32x4xf32>
    %cst_209 = arith.constant dense<0.000000e+00> : vector<16x4xf32>
    %646 = tpu.matmul %644, %645, %cst_209 {dimension_numbers = #tpu.dot_dimension_numbers<[1], [0], [0], [1], [0, 0, 1, 1], [], []>} : vector<16x32xf32>, vector<32x4xf32>, vector<16x4xf32> -> vector<16x4xf32>
    %c0_210 = arith.constant 0 : index
    %c0_211 = arith.constant 0 : index
    %647 = vector.load %arg9[%c0_210, %c0_211] : memref<1x4xf32, #tpu.memory_space<vmem>>, vector<1x4xf32>
    %648 = vector.broadcast %647 : vector<1x4xf32> to vector<16x4xf32>
    %649 = arith.addf %646, %648 : vector<16x4xf32>
    %c0_212 = arith.constant 0 : index
    %c0_213 = arith.constant 0 : index
    %650 = vector.load %arg10[%c0_212, %c0_213] : memref<16x4xf32, #tpu.memory_space<vmem>>, vector<16x4xf32>
    tpu.vector_store %arg10[%c0_212, %c0_213], %649 {strides = array<i32>} : memref<16x4xf32, #tpu.memory_space<vmem>>, vector<16x4xf32>,
    return
  }
  func.func @transform_0(%arg0: i32) -> (i32, i32) {
    %c0_i32 = arith.constant 0 : i32
    %c0_i32_0 = arith.constant 0 : i32
    %c0_i32_1 = arith.constant 0 : i32
    return %c0_i32, %c0_i32_0 : i32, i32
  }
  func.func @transform_1(%arg0: i32) -> (i32, i32, i32) {
    %c0_i32 = arith.constant 0 : i32
    %c0_i32_0 = arith.constant 0 : i32
    %c0_i32_1 = arith.constant 0 : i32
    %c0_i32_2 = arith.constant 0 : i32
    return %c0_i32, %c0_i32_0, %c0_i32_1 : i32, i32, i32
  }
  func.func @transform_2(%arg0: i32) -> (i32, i32) {
    %c0_i32 = arith.constant 0 : i32
    %c0_i32_0 = arith.constant 0 : i32
    %c0_i32_1 = arith.constant 0 : i32
    return %c0_i32, %c0_i32_0 : i32, i32
  }
  func.func @transform_3(%arg0: i32) -> (i32, i32) {
    %c0_i32 = arith.constant 0 : i32
    %c0_i32_0 = arith.constant 0 : i32
    %c0_i32_1 = arith.constant 0 : i32
    return %c0_i32, %c0_i32_0 : i32, i32
  }
  func.func @transform_4(%arg0: i32) -> (i32, i32) {
    %c0_i32 = arith.constant 0 : i32
    %c0_i32_0 = arith.constant 0 : i32
    %c0_i32_1 = arith.constant 0 : i32
    return %c0_i32, %c0_i32_0 : i32, i32
  }
  func.func @transform_5(%arg0: i32) -> (i32, i32) {
    %c0_i32 = arith.constant 0 : i32
    %c0_i32_0 = arith.constant 0 : i32
    %c0_i32_1 = arith.constant 0 : i32
    return %c0_i32, %c0_i32_0 : i32, i32
  }
  func.func @transform_6(%arg0: i32) -> (i32, i32) {
    %c0_i32 = arith.constant 0 : i32
    %c0_i32_0 = arith.constant 0 : i32
    %c0_i32_1 = arith.constant 0 : i32
    return %c0_i32, %c0_i32_0 : i32, i32
  }
  func.func @transform_7(%arg0: i32) -> (i32, i32) {
    %c0_i32 = arith.constant 0 : i32
    %c0_i32_0 = arith.constant 0 : i32
    %c0_i32_1 = arith.constant 0 : i32
    return %c0_i32, %c0_i32_0 : i32, i32
  }
  func.func @transform_8(%arg0: i32) -> (i32, i32) {
    %c0_i32 = arith.constant 0 : i32
    %c0_i32_0 = arith.constant 0 : i32
    %c0_i32_1 = arith.constant 0 : i32
    return %c0_i32, %c0_i32_0 : i32, i32
  }
  func.func @transform_9(%arg0: i32) -> (i32, i32) {
    %c0_i32 = arith.constant 0 : i32
    %c0_i32_0 = arith.constant 0 : i32
    %c0_i32_1 = arith.constant 0 : i32
    return %c0_i32, %c0_i32_0 : i32, i32
  }
  func.func @transform_10(%arg0: i32) -> (i32, i32) {
    %c0_i32 = arith.constant 0 : i32
    %c0_i32_0 = arith.constant 0 : i32
    %c0_i32_1 = arith.constant 0 : i32
    return %c0_i32, %c0_i32_0 : i32, i32
  }
}

</mosaic_0001>

<bundles_post_ra>
// kernel: tpu_custom_call.1
= control target key start
LH: loop header
LB: loop body
LE: loop exit
PB: predicated region body
PF: predicated region fallthrough
CT: control target
= control target key end

     0   :  { %vm62_vm0 = vcmask 64512   ;;  %v2234_v0 = vmov 0.0   ;;  %vm2235_vm1 = vmmov 0   ;;  %v2236_v4 = vmov 0   ;;  %s2720_s2 = inlined_call_operand.vmem [shape: f32[8,32], index: 2, kind: input, shape index: {}]   ;;  %s2721_s0 = inlined_call_operand.vmem [shape: f32[2,8], index: 0, kind: input, shape index: {}]   ;;  %s2722_s1 = inlined_call_operand.vmem [shape: f32[9,2,1], index: 1, kind: input, shape index: {}]   ;;  %s2723_s3 = inlined_call_operand.vmem [shape: f32[5,32], index: 3, kind: input, shape index: {}]   ;;  %s2724_s4 = inlined_call_operand.vmem [shape: f32[32,8], index: 4, kind: input, shape index: {}]   ;;  %s2725_s5 = inlined_call_operand.vmem [shape: f32[3,8], index: 5, kind: input, shape index: {}]   ;;  %s2726_s10 = inlined_call_operand.vmem [shape: f32[16,8], index: 10, kind: output, shape index: {1}]   ;;  %s2727_s6 = inlined_call_operand.vmem [shape: f32[8,32], index: 6, kind: input, shape index: {}]   ;;  %s2728_s7 = inlined_call_operand.vmem [shape: f32[32,4], index: 7, kind: input, shape index: {}]   ;;  %s2729_s8 = inlined_call_operand.vmem [shape: f32[1,4], index: 8, kind: input, shape index: {}]   ;;  %s2730_s9 = inlined_call_operand.vmem [shape: f32[16,4], index: 9, kind: output, shape index: {0}]  }
   0x1   :  { %1996 = vmatprep.subr.mxu0 %v2234_v0  ;;  %v2297_v1 = vld [vmem:[%s2720_s2] sm:$0xff]  ;;  %1998 = vmatprep.mubr.msk.f32.mxu0 %vm2235_vm1, %v2234_v0  ;;  %vm141_vm2 = vcmask 254976   ;;  %v2237_v19 = vmov 0.0|0.0   ;;  %v44_v21 = vld [vmem:[%s2724_s4 + $0x8] sm:$0xff]  ;;  %v45_v22 = vld [vmem:[%s2724_s4 + $0x10] sm:$0xff]  ;;  %vm173_vm4 = vcmask 261120  }
   0x2   :  { %v2304_v2 = vld [vmem:[%s2721_s0] sm:$0x3]  ;;  %1997 = vmatpush3.msra.mxu0 %v2297_v1  ;;  %2200 = vset.pattern.permute.xlu0 %v2236_v4  ;;  %v46_v24 = vld [vmem:[%s2724_s4 + $0x18] sm:$0xff]  ;;  %v2360_v30 = vld [vmem:[%s2723_s3 + $0x2] ss:$0 sm:$0xff]  ;;  %vm247_vm5 = vcmask 58368  }
   0x3   :  { %v2309_v3 = vld [vmem:[%s2722_s1] sm:$0x3]  ;;  %1999 = vmatmul.mubr.msk.f32.vlgmr.msra.gmra.mrb[0].mxu0 %vm62_vm0, %v2304_v2  ;;  %2009 = vmatprep.mubr.msk.f32.mxu1 %vm2235_vm1, %v2234_v0  ;;  %v2352_v25 = vpack.c.bf16 %v46_v24, %v45_v22  ;;  %v2365_v32 = vld [vmem:[%s2723_s3 + $0x3] ss:$0 sm:$0xff]  ;;  %v2402_v56 = vld [vmem:[%s2725_s5 + $0x2] ss:$0 sm:$0xff] }
   0x4   :  { %54 = vperm.xlu0 %2200, %v2309_v3   ;;  %2201 = vset.pattern.permute.xlu1 %v2236_v4  ;;  %v2324_v5 = vld [vmem:[%s2723_s3] ss:$0 sm:$0xff]  ;;  %v2330_v9 = vld [vmem:[%s2723_s3 + $0x1] ss:$0 sm:$0xff]  ;;  %v1887_v47 = vld [vmem:[%s2722_s1 + $0x2] sm:$0x3] }
   0x5   :  { %2012 = vmatprep.subr.mxu0 %v2234_v0  ;;  %2014 = vmatprep.mubr.msk.f32.mxu0 %vm2235_vm1, %v2234_v0  ;;  %v43_v20 = vld [vmem:[%s2724_s4] sm:$0xff]  ;;  %v51_v48 = vsub.f32 %v1887_v47, %v2309_v3 }
   0x6   :  { %2013 = vmatpush3.msra.mxu0 %v2297_v1  ;;  %2140 = vmatprep.subr.bf16.mxu1 %v2237_v19  ;;  %v2346_v23 = vpack.c.bf16 %v44_v21, %v43_v20  ;;  %v2379_v37 = vld [vmem:[%s2725_s5] ss:$0 sm:$0xff]  ;;  %v2391_v49 = vld [vmem:[%s2722_s1 + $0x2] sm:$0x3]  ;;  %v2397_v54 = vld [vmem:[%s2725_s5 + $0x1] ss:$0 sm:$0xff] }
   0x7   :  { %2146 = vmatprep.subr.bf16.mxu0 %v2237_v19 }
   0x8   :  { %2142 = vmatpush3.bf16.msra.mxu1 %v2346_v23 }
   0x9   :  { %2143 = vmatprep.subr.bf16.mxu1 %v2237_v19 }
   0xc   :  { %2145 = vmatpush3.bf16.msra.mxu1 %v2352_v25 }
   0xd   :  { %2152 = vmatprep.subr.bf16.mxu1 %v2237_v19 }
  0x83   :  { %v55_v6 = vpop.permute.xlu0 %54 }
  0x84   :  { %v61_v7 = vmul.f32 %v2324_v5, %v55_v6 }
  0xd6   :  { %v132_v8 = vpop.f32.mrb[0].mxu0 }
  0xd7   :  { %v133_v10 = vadd.f32 %v132_v8, %v61_v7  ;;  %v2000_v11 = vpop.f32.mrb[1].mxu0 }
  0xd9   :  { %v140_v12 = vadd.f32 %v2330_v9, %v133_v10 }
  0xdb   :  { %v142_v13 = vsel %vm141_vm2, %v140_v12, 0.0 }
  0xdc   :  { %143 = vadd.xlane.f32.xlu0 %v142_v13 }
 0x169   :  { %v144_v14 = vpop.xlane.xlu0 %143 }
 0x16a   :  { %v146_v15 = vmul.f32 0.03125, %v144_v14 }
 0x16c   :  { %v147_v16 = vsub.f32 %v140_v12, %v146_v15 }
 0x16e   :  { %v148_v17 = vmul.f32 %v147_v16, %v147_v16 }
 0x170   :  { %v149_v18 = vsel %vm141_vm2, %v148_v17, 0.0 }
 0x171   :  { %150 = vadd.xlane.f32.xlu1 %v149_v18 }
 0x1fe   :  { %v151_v26 = vpop.xlane.xlu1 %150 }
 0x1ff   :  { %v152_v27 = vmul.f32 0.03125, %v151_v26 }
 0x201   :  { %v153_v28 = vadd.f32 1e-05, %v152_v27 }
 0x203   :  { %2202 = vrsqrt.f32 %v153_v28 }
 0x20d   :  { %v2203_v29 = vpop.eup %2202 }
 0x20e   :  { %v155_v31 = vmul.f32 %v2203_v29, %v147_v16 }
 0x210   :  { %v160_v33 = vmul.f32 %v2360_v30, %v155_v31 }
 0x212   :  { %v165_v34 = vadd.f32 %v2365_v32, %v160_v33 }
 0x214   :  { %vm166_vm3 = vcmp.gt.f32.partialorder %v165_v34, 0.0  ;;  %v167_v35 = vmul.f32 0.1, %v165_v34 }
 0x216   :  { %v168_v36 = vsel %vm166_vm3, %v165_v34, %v167_v35 }
 0x217   :  { %2010 = vmatmul.mubr.msk.f32.vlgmr.msra.gmra.mrb[0].mxu1 %vm173_vm4, %v168_v36 }
 0x218   :  { %2154 = vmatpush3.bf16.msra.mxu1 %v2346_v23  ;;  %2041 = vmatprep.mubr.msk.f32.mxu1 %vm2235_vm1, %v2234_v0 }
 0x219   :  { %2155 = vmatprep.subr.bf16.mxu1 %v2237_v19 }
 0x21c   :  { %2157 = vmatpush3.bf16.msra.mxu1 %v2352_v25 }
 0x21d   :  { %2060 = vmatprep.subr.mxu1 %v2234_v0 }
 0x2ea   :  { %v243_v38 = vpop.f32.mrb[0].mxu1 }
 0x2eb   :  { %v244_v39 = vadd.f32 %v2379_v37, %v243_v38  ;;  %v2011_v40 = vpop.f32.mrb[1].mxu1 }
 0x2ec   :  { %v1898_v40 = vld [vmem:[%s2722_s1 + $0x4] sm:$0x3] }
 0x2ed   :  { %v248_v41 = vsel %vm247_vm5, %v244_v39, 0.0 }
 0x2ee   :  { %249 = vadd.xlane.f32.xlu1 %v248_v41  ;;  %v286_v41 = vsub.f32 %v1898_v40, %v2391_v49 }
 0x37b   :  { %v250_v42 = vpop.xlane.xlu1 %249 }
 0x37c   :  { %v252_v43 = vmul.f32 0.125, %v250_v42  ;;  %v2443_v42 = vld [vmem:[%s2722_s1 + $0x4] sm:$0x3] }
 0x37e   :  { %v253_v44 = vsub.f32 %v244_v39, %v252_v43 }
 0x380   :  { %v254_v45 = vmul.f32 %v253_v44, %v253_v44 }
 0x382   :  { %v255_v46 = vsel %vm247_vm5, %v254_v45, 0.0 }
 0x383   :  { %256 = vadd.xlane.f32.xlu1 %v255_v46 }
 0x394   :  { %277 = vperm.xlu1 %2201, %v51_v48  }
 0x398   :  { %289 = vperm.xlu1 %2201, %v2391_v49  }
 0x410   :  { %v257_v50 = vpop.xlane.xlu1 %256 }
 0x411   :  { %v258_v51 = vmul.f32 0.125, %v257_v50 }
 0x413   :  { %v259_v52 = vadd.f32 1e-05, %v258_v51 }
 0x414   :  { %v278_v61 = vpop.permute.xlu1 %277 }
 0x415   :  { %2204 = vrsqrt.f32 %v259_v52 }
 0x41f   :  { %v2205_v53 = vpop.eup %2204 }
 0x420   :  { %v261_v55 = vmul.f32 %v2205_v53, %v253_v44 }
 0x422   :  { %v266_v57 = vmul.f32 %v2397_v54, %v261_v55 }
 0x424   :  { %v271_v58 = vadd.f32 %v2402_v56, %v266_v57 }
 0x426   :  { %vm272_vm6 = vcmp.gt.f32.partialorder %v271_v58, 0.0  ;;  %v273_v59 = vmul.f32 0.1, %v271_v58 }
 0x428   :  { %v274_v60 = vsel %vm272_vm6, %v271_v58, %v273_v59 }
 0x429   :  { %v280_v62 = vmul.f32 %v278_v61, %v274_v60 }
 0x42b   :  { %v2407_v63 = vadd.f32 %v280_v62, %v2304_v2  ;;  %v290_v2 = vpop.permute.xlu1 %289 }
 0x42c   :  { %v292_v3 = vmul.f32 %v2324_v5, %v290_v2 }
 0x42d   :  { %282 = vst.msk [vmem:[%s2726_s10] sm:$0x3] %vm247_vm5, %v2407_v63  ;;  %2015 = vmatmul.mubr.msk.f32.vlgmr.msra.gmra.mrb[2].mxu0 %vm62_vm0, %v2407_v63 }
 0x42e   :  { %2148 = vmatpush3.bf16.msra.mxu0 %v2346_v23  ;;  %2025 = vmatprep.mubr.msk.f32.mxu0 %vm2235_vm1, %v2234_v0 }
 0x42f   :  { %2149 = vmatprep.subr.bf16.mxu0 %v2237_v19 }
 0x432   :  { %2151 = vmatpush3.bf16.msra.mxu0 %v2352_v25 }
 0x433   :  { %2028 = vmatprep.subr.mxu0 %v2234_v0 }
 0x500   :  { %v362_v4 = vpop.f32.mrb[2].mxu0 }
 0x501   :  { %v363_v6 = vadd.f32 %v362_v4, %v292_v3  ;;  %v2016_v7 = vpop.f32.mrb[3].mxu0 }
 0x503   :  { %v366_v8 = vadd.f32 %v2330_v9, %v363_v6 }
 0x505   :  { %v367_v10 = vsel %vm141_vm2, %v366_v8, 0.0 }
 0x506   :  { %368 = vadd.xlane.f32.xlu1 %v367_v10 }
 0x593   :  { %v369_v11 = vpop.xlane.xlu1 %368 }
 0x594   :  { %v370_v12 = vmul.f32 0.03125, %v369_v11 }
 0x596   :  { %v371_v13 = vsub.f32 %v366_v8, %v370_v12 }
 0x598   :  { %v372_v14 = vmul.f32 %v371_v13, %v371_v13 }
 0x59a   :  { %v373_v15 = vsel %vm141_vm2, %v372_v14, 0.0 }
 0x59b   :  { %374 = vadd.xlane.f32.xlu0 %v373_v15 }
 0x628   :  { %v375_v16 = vpop.xlane.xlu0 %374 }
 0x629   :  { %v376_v17 = vmul.f32 0.03125, %v375_v16 }
 0x62b   :  { %v377_v18 = vadd.f32 1e-05, %v376_v17 }
 0x62d   :  { %2206 = vrsqrt.f32 %v377_v18 }
 0x637   :  { %v2207_v20 = vpop.eup %2206 }
 0x638   :  { %v379_v21 = vmul.f32 %v2207_v20, %v371_v13 }
 0x63a   :  { %v380_v22 = vmul.f32 %v2360_v30, %v379_v21 }
 0x63c   :  { %v381_v24 = vadd.f32 %v2365_v32, %v380_v22 }
 0x63e   :  { %vm382_vm7 = vcmp.gt.f32.partialorder %v381_v24, 0.0  ;;  %v383_v26 = vmul.f32 0.1, %v381_v24 }
 0x640   :  { %v384_v27 = vsel %vm382_vm7, %v381_v24, %v383_v26 }
 0x641   :  { %2026 = vmatmul.mubr.msk.f32.vlgmr.msra.gmra.mrb[4].mxu0 %vm173_vm4, %v384_v27 }
 0x642   :  { %2029 = vmatpush3.msra.mxu0 %v2297_v1  ;;  %2030 = vmatprep.mubr.msk.f32.mxu0 %vm2235_vm1, %v2234_v0 }
 0x643   :  { %2044 = vmatprep.subr.mxu0 %v2234_v0 }
 0x714   :  { %v454_v28 = vpop.f32.mrb[4].mxu0 }
 0x715   :  { %v455_v29 = vadd.f32 %v2379_v37, %v454_v28  ;;  %v2027_v31 = vpop.f32.mrb[5].mxu0 }
 0x716   :  { %v1902_v31 = vld [vmem:[%s2722_s1 + $0x6] sm:$0x3] }
 0x717   :  { %v458_v33 = vsel %vm247_vm5, %v455_v29, 0.0 }
 0x718   :  { %459 = vadd.xlane.f32.xlu0 %v458_v33  ;;  %v487_v33 = vsub.f32 %v1902_v31, %v2443_v42 }
 0x7a5   :  { %v460_v34 = vpop.xlane.xlu0 %459 }
 0x7a6   :  { %v461_v35 = vmul.f32 0.125, %v460_v34  ;;  %v2483_v34 = vld [vmem:[%s2722_s1 + $0x6] sm:$0x3] }
 0x7a8   :  { %v462_v36 = vsub.f32 %v455_v29, %v461_v35 }
 0x7aa   :  { %v463_v38 = vmul.f32 %v462_v36, %v462_v36 }
 0x7ac   :  { %v464_v39 = vsel %vm247_vm5, %v463_v38, 0.0 }
 0x7ad   :  { %465 = vadd.xlane.f32.xlu0 %v464_v39 }
 0x7c3   :  { %478 = vperm.xlu0 %2200, %v286_v41  }
 0x7c7   :  { %490 = vperm.xlu0 %2200, %v2443_v42  }
 0x83a   :  { %v466_v43 = vpop.xlane.xlu0 %465 }
 0x83b   :  { %v467_v44 = vmul.f32 0.125, %v466_v43 }
 0x83d   :  { %v468_v45 = vadd.f32 1e-05, %v467_v44 }
 0x83f   :  { %2208 = vrsqrt.f32 %v468_v45 }
 0x842   :  { %v479_v52 = vpop.permute.xlu0 %478 }
 0x846   :  { %v491_v57 = vpop.permute.xlu0 %490 }
 0x847   :  { %v493_v58 = vmul.f32 %v2324_v5, %v491_v57 }
 0x849   :  { %v2209_v46 = vpop.eup %2208 }
 0x84a   :  { %v470_v47 = vmul.f32 %v2209_v46, %v462_v36 }
 0x84c   :  { %v471_v48 = vmul.f32 %v2397_v54, %v470_v47 }
 0x84e   :  { %v472_v50 = vadd.f32 %v2402_v56, %v471_v48 }
 0x850   :  { %vm473_vm8 = vcmp.gt.f32.partialorder %v472_v50, 0.0  ;;  %v474_v49 = vmul.f32 0.1, %v472_v50 }
 0x852   :  { %v475_v51 = vsel %vm473_vm8, %v472_v50, %v474_v49  ;;  %vm1876_vm8 = vcmask 31744  }
 0x853   :  { %v481_v53 = vmul.f32 %v479_v52, %v475_v51 }
 0x855   :  { %v2449_v55 = vadd.f32 %v481_v53, %v2407_v63 }
 0x857   :  { %483 = vst.msk [vmem:[%s2726_s10 + $0x2] sm:$0x3] %vm247_vm5, %v2449_v55  ;;  %2031 = vmatmul.mubr.msk.f32.vlgmr.msra.gmra.mrb[6].mxu0 %vm62_vm0, %v2449_v55 }
 0x858   :  { %2045 = vmatpush3.msra.mxu0 %v2297_v1  ;;  %2046 = vmatprep.mubr.msk.f32.mxu0 %vm2235_vm1, %v2234_v0 }
 0x859   :  { %2158 = vmatprep.subr.bf16.mxu0 %v2237_v19 }
 0x92a   :  { %v563_v59 = vpop.f32.mrb[6].mxu0 }
 0x92b   :  { %v564_v60 = vadd.f32 %v563_v59, %v493_v58  ;;  %v2032_v61 = vpop.f32.mrb[7].mxu0 }
 0x92d   :  { %v567_v62 = vadd.f32 %v2330_v9, %v564_v60 }
 0x92f   :  { %v568_v63 = vsel %vm141_vm2, %v567_v62, 0.0 }
 0x930   :  { %569 = vadd.xlane.f32.xlu1 %v568_v63 }
 0x9bd   :  { %v570_v2 = vpop.xlane.xlu1 %569 }
 0x9be   :  { %v571_v3 = vmul.f32 0.03125, %v570_v2 }
 0x9c0   :  { %v572_v4 = vsub.f32 %v567_v62, %v571_v3 }
 0x9c2   :  { %v573_v6 = vmul.f32 %v572_v4, %v572_v4 }
 0x9c4   :  { %v574_v7 = vsel %vm141_vm2, %v573_v6, 0.0 }
 0x9c5   :  { %575 = vadd.xlane.f32.xlu0 %v574_v7 }
 0xa52   :  { %v576_v8 = vpop.xlane.xlu0 %575 }
 0xa53   :  { %v577_v10 = vmul.f32 0.03125, %v576_v8 }
 0xa55   :  { %v578_v11 = vadd.f32 1e-05, %v577_v10 }
 0xa57   :  { %2210 = vrsqrt.f32 %v578_v11 }
 0xa61   :  { %v2211_v12 = vpop.eup %2210 }
 0xa62   :  { %v580_v13 = vmul.f32 %v2211_v12, %v572_v4 }
 0xa64   :  { %v581_v14 = vmul.f32 %v2360_v30, %v580_v13 }
 0xa66   :  { %v582_v15 = vadd.f32 %v2365_v32, %v581_v14 }
 0xa68   :  { %vm583_vm9 = vcmp.gt.f32.partialorder %v582_v15, 0.0  ;;  %v584_v16 = vmul.f32 0.1, %v582_v15 }
 0xa6a   :  { %v585_v17 = vsel %vm583_vm9, %v582_v15, %v584_v16 }
 0xa6b   :  { %2042 = vmatmul.mubr.msk.f32.vlgmr.msra.gmra.mrb[2].mxu1 %vm173_vm4, %v585_v17 }
 0xa6c   :  { %2061 = vmatpush3.msra.mxu1 %v2297_v1  ;;  %2062 = vmatprep.mubr.msk.f32.mxu1 %vm2235_vm1, %v2234_v0 }
 0xa6d   :  { %2164 = vmatprep.subr.bf16.mxu1 %v2237_v19 }
 0xb3e   :  { %v655_v18 = vpop.f32.mrb[2].mxu1 }
 0xb3f   :  { %v656_v20 = vadd.f32 %v2379_v37, %v655_v18  ;;  %v2043_v21 = vpop.f32.mrb[3].mxu1 }
 0xb40   :  { %v1906_v21 = vld [vmem:[%s2722_s1 + $0x8] sm:$0x3] }
 0xb41   :  { %v659_v22 = vsel %vm247_vm5, %v656_v20, 0.0 }
 0xb42   :  { %660 = vadd.xlane.f32.xlu1 %v659_v22  ;;  %v688_v22 = vsub.f32 %v1906_v21, %v2483_v34 }
 0xbcf   :  { %v661_v24 = vpop.xlane.xlu1 %660 }
 0xbd0   :  { %v662_v26 = vmul.f32 0.125, %v661_v24  ;;  %v2525_v24 = vld [vmem:[%s2722_s1 + $0x8] sm:$0x3] }
 0xbd2   :  { %v663_v27 = vsub.f32 %v656_v20, %v662_v26 }
 0xbd4   :  { %v664_v28 = vmul.f32 %v663_v27, %v663_v27 }
 0xbd6   :  { %v665_v29 = vsel %vm247_vm5, %v664_v28, 0.0 }
 0xbd7   :  { %666 = vadd.xlane.f32.xlu1 %v665_v29 }
 0xbe8   :  { %679 = vperm.xlu1 %2201, %v487_v33  }
 0xbec   :  { %691 = vperm.xlu1 %2201, %v2483_v34  }
 0xc64   :  { %v667_v35 = vpop.xlane.xlu1 %666 }
 0xc65   :  { %v668_v36 = vmul.f32 0.125, %v667_v35 }
 0xc67   :  { %v669_v38 = vadd.f32 1e-05, %v668_v36 }
 0xc68   :  { %v680_v45 = vpop.permute.xlu1 %679 }
 0xc69   :  { %2212 = vrsqrt.f32 %v669_v38 }
 0xc6c   :  { %v692_v48 = vpop.permute.xlu1 %691 }
 0xc6d   :  { %v694_v50 = vmul.f32 %v2324_v5, %v692_v48 }
 0xc73   :  { %v2213_v39 = vpop.eup %2212 }
 0xc74   :  { %v671_v40 = vmul.f32 %v2213_v39, %v663_v27 }
 0xc76   :  { %v672_v41 = vmul.f32 %v2397_v54, %v671_v40 }
 0xc78   :  { %v673_v43 = vadd.f32 %v2402_v56, %v672_v41 }
 0xc7a   :  { %vm674_vm10 = vcmp.gt.f32.partialorder %v673_v43, 0.0  ;;  %v675_v42 = vmul.f32 0.1, %v673_v43 }
 0xc7c   :  { %v676_v44 = vsel %vm674_vm10, %v673_v43, %v675_v42 }
 0xc7d   :  { %v682_v46 = vmul.f32 %v680_v45, %v676_v44 }
 0xc7f   :  { %v2489_v47 = vadd.f32 %v682_v46, %v2449_v55 }
 0xc81   :  { %684 = vst.msk [vmem:[%s2726_s10 + $0x4] sm:$0x3] %vm247_vm5, %v2489_v47  ;;  %2047 = vmatmul.mubr.msk.f32.vlgmr.msra.gmra.mrb[8].mxu0 %vm62_vm0, %v2489_v47 }
 0xc82   :  { %2160 = vmatpush3.bf16.msra.mxu0 %v2346_v23  ;;  %2057 = vmatprep.mubr.msk.f32.mxu0 %vm2235_vm1, %v2234_v0 }
 0xc83   :  { %2161 = vmatprep.subr.bf16.mxu0 %v2237_v19 }
 0xc86   :  { %2163 = vmatpush3.bf16.msra.mxu0 %v2352_v25 }
 0xc87   :  { %2076 = vmatprep.subr.mxu0 %v2234_v0 }
 0xd54   :  { %v764_v49 = vpop.f32.mrb[8].mxu0 }
 0xd55   :  { %v765_v51 = vadd.f32 %v764_v49, %v694_v50  ;;  %v2048_v52 = vpop.f32.mrb[9].mxu0 }
 0xd57   :  { %v768_v53 = vadd.f32 %v2330_v9, %v765_v51 }
 0xd59   :  { %v769_v55 = vsel %vm141_vm2, %v768_v53, 0.0 }
 0xd5a   :  { %770 = vadd.xlane.f32.xlu1 %v769_v55 }
 0xde7   :  { %v771_v57 = vpop.xlane.xlu1 %770 }
 0xde8   :  { %v772_v58 = vmul.f32 0.03125, %v771_v57 }
 0xdea   :  { %v773_v59 = vsub.f32 %v768_v53, %v772_v58 }
 0xdec   :  { %v774_v60 = vmul.f32 %v773_v59, %v773_v59 }
 0xdee   :  { %v775_v61 = vsel %vm141_vm2, %v774_v60, 0.0 }
 0xdef   :  { %776 = vadd.xlane.f32.xlu0 %v775_v61 }
 0xe7c   :  { %v777_v62 = vpop.xlane.xlu0 %776 }
 0xe7d   :  { %v778_v63 = vmul.f32 0.03125, %v777_v62 }
 0xe7f   :  { %v779_v2 = vadd.f32 1e-05, %v778_v63 }
 0xe81   :  { %2214 = vrsqrt.f32 %v779_v2 }
 0xe8b   :  { %v2215_v3 = vpop.eup %2214 }
 0xe8c   :  { %v781_v4 = vmul.f32 %v2215_v3, %v773_v59 }
 0xe8e   :  { %v782_v6 = vmul.f32 %v2360_v30, %v781_v4 }
 0xe90   :  { %v783_v7 = vadd.f32 %v2365_v32, %v782_v6 }
 0xe92   :  { %vm784_vm11 = vcmp.gt.f32.partialorder %v783_v7, 0.0  ;;  %v785_v8 = vmul.f32 0.1, %v783_v7 }
 0xe94   :  { %v786_v10 = vsel %vm784_vm11, %v783_v7, %v785_v8 }
 0xe95   :  { %2058 = vmatmul.mubr.msk.f32.vlgmr.msra.gmra.mrb[10].mxu0 %vm173_vm4, %v786_v10 }
 0xe96   :  { %2077 = vmatpush3.msra.mxu0 %v2297_v1  ;;  %2078 = vmatprep.mubr.msk.f32.mxu0 %vm2235_vm1, %v2234_v0 }
 0xe97   :  { %2170 = vmatprep.subr.bf16.mxu0 %v2237_v19 }
 0xf68   :  { %v856_v11 = vpop.f32.mrb[10].mxu0 }
 0xf69   :  { %v857_v12 = vadd.f32 %v2379_v37, %v856_v11  ;;  %v2059_v13 = vpop.f32.mrb[11].mxu0 }
 0xf6a   :  { %v1910_v13 = vld [vmem:[%s2722_s1 + $0xa] sm:$0x3] }
 0xf6b   :  { %v860_v14 = vsel %vm247_vm5, %v857_v12, 0.0 }
 0xf6c   :  { %861 = vadd.xlane.f32.xlu0 %v860_v14  ;;  %v889_v14 = vsub.f32 %v1910_v13, %v2525_v24 }
 0xff9   :  { %v862_v15 = vpop.xlane.xlu0 %861 }
 0xffa   :  { %v863_v16 = vmul.f32 0.125, %v862_v15  ;;  %v2567_v15 = vld [vmem:[%s2722_s1 + $0xa] sm:$0x3] }
 0xffc   :  { %v864_v17 = vsub.f32 %v857_v12, %v863_v16 }
 0xffe   :  { %v865_v18 = vmul.f32 %v864_v17, %v864_v17 }
0x1000   :  { %v866_v20 = vsel %vm247_vm5, %v865_v18, 0.0 }
0x1001   :  { %867 = vadd.xlane.f32.xlu0 %v866_v20 }
0x1017   :  { %880 = vperm.xlu0 %2200, %v688_v22  }
0x101b   :  { %892 = vperm.xlu0 %2200, %v2525_v24  }
0x108e   :  { %v868_v26 = vpop.xlane.xlu0 %867 }
0x108f   :  { %v869_v27 = vmul.f32 0.125, %v868_v26 }
0x1091   :  { %v870_v28 = vadd.f32 1e-05, %v869_v27 }
0x1093   :  { %2216 = vrsqrt.f32 %v870_v28 }
0x1096   :  { %v881_v38 = vpop.permute.xlu0 %880 }
0x109a   :  { %v893_v41 = vpop.permute.xlu0 %892 }
0x109b   :  { %v895_v43 = vmul.f32 %v2324_v5, %v893_v41 }
0x109d   :  { %v2217_v29 = vpop.eup %2216 }
0x109e   :  { %v872_v31 = vmul.f32 %v2217_v29, %v864_v17 }
0x10a0   :  { %v873_v33 = vmul.f32 %v2397_v54, %v872_v31 }
0x10a2   :  { %v874_v35 = vadd.f32 %v2402_v56, %v873_v33 }
0x10a4   :  { %vm875_vm12 = vcmp.gt.f32.partialorder %v874_v35, 0.0  ;;  %v876_v34 = vmul.f32 0.1, %v874_v35 }
0x10a6   :  { %v877_v36 = vsel %vm875_vm12, %v874_v35, %v876_v34 }
0x10a7   :  { %v883_v39 = vmul.f32 %v881_v38, %v877_v36 }
0x10a9   :  { %v2531_v40 = vadd.f32 %v883_v39, %v2489_v47 }
0x10ab   :  { %885 = vst.msk [vmem:[%s2726_s10 + $0x6] sm:$0x3] %vm247_vm5, %v2531_v40  ;;  %2063 = vmatmul.mubr.msk.f32.vlgmr.msra.gmra.mrb[4].mxu1 %vm62_vm0, %v2531_v40 }
0x10ac   :  { %2166 = vmatpush3.bf16.msra.mxu1 %v2346_v23  ;;  %2073 = vmatprep.mubr.msk.f32.mxu1 %vm2235_vm1, %v2234_v0 }
0x10ad   :  { %2167 = vmatprep.subr.bf16.mxu1 %v2237_v19 }
0x10b0   :  { %2169 = vmatpush3.bf16.msra.mxu1 %v2352_v25 }
0x10b1   :  { %2092 = vmatprep.subr.mxu1 %v2234_v0 }
0x117e   :  { %v965_v42 = vpop.f32.mrb[4].mxu1 }
0x117f   :  { %v966_v44 = vadd.f32 %v965_v42, %v895_v43  ;;  %v2064_v45 = vpop.f32.mrb[5].mxu1 }
0x1181   :  { %v969_v46 = vadd.f32 %v2330_v9, %v966_v44 }
0x1183   :  { %v970_v47 = vsel %vm141_vm2, %v969_v46, 0.0 }
0x1184   :  { %971 = vadd.xlane.f32.xlu1 %v970_v47 }
0x1211   :  { %v972_v48 = vpop.xlane.xlu1 %971 }
0x1212   :  { %v973_v50 = vmul.f32 0.03125, %v972_v48 }
0x1214   :  { %v974_v49 = vsub.f32 %v969_v46, %v973_v50 }
0x1216   :  { %v975_v51 = vmul.f32 %v974_v49, %v974_v49 }
0x1218   :  { %v976_v52 = vsel %vm141_vm2, %v975_v51, 0.0 }
0x1219   :  { %977 = vadd.xlane.f32.xlu0 %v976_v52 }
0x12a6   :  { %v978_v53 = vpop.xlane.xlu0 %977 }
0x12a7   :  { %v979_v55 = vmul.f32 0.03125, %v978_v53 }
0x12a9   :  { %v980_v57 = vadd.f32 1e-05, %v979_v55 }
0x12ab   :  { %2218 = vrsqrt.f32 %v980_v57 }
0x12b5   :  { %v2219_v58 = vpop.eup %2218 }
0x12b6   :  { %v982_v59 = vmul.f32 %v2219_v58, %v974_v49 }
0x12b8   :  { %v983_v60 = vmul.f32 %v2360_v30, %v982_v59 }
0x12ba   :  { %v984_v61 = vadd.f32 %v2365_v32, %v983_v60 }
0x12bc   :  { %vm985_vm13 = vcmp.gt.f32.partialorder %v984_v61, 0.0  ;;  %v986_v62 = vmul.f32 0.1, %v984_v61 }
0x12be   :  { %v987_v63 = vsel %vm985_vm13, %v984_v61, %v986_v62 }
0x12bf   :  { %2074 = vmatmul.mubr.msk.f32.vlgmr.msra.gmra.mrb[6].mxu1 %vm173_vm4, %v987_v63 }
0x12c0   :  { %2093 = vmatpush3.msra.mxu1 %v2297_v1  ;;  %2094 = vmatprep.mubr.msk.f32.mxu1 %vm2235_vm1, %v2234_v0 }
0x12c1   :  { %2176 = vmatprep.subr.bf16.mxu1 %v2237_v19 }
0x1392   :  { %v1057_v2 = vpop.f32.mrb[6].mxu1 }
0x1393   :  { %v1058_v3 = vadd.f32 %v2379_v37, %v1057_v2  ;;  %v2075_v4 = vpop.f32.mrb[7].mxu1 }
0x1395   :  { %v1061_v6 = vsel %vm247_vm5, %v1058_v3, 0.0 }
0x1396   :  { %1062 = vadd.xlane.f32.xlu1 %v1061_v6  ;;  %v2609_v6 = vld [vmem:[%s2722_s1 + $0xc] sm:$0x3] }
0x1423   :  { %v1063_v7 = vpop.xlane.xlu1 %1062 }
0x1424   :  { %v1064_v8 = vmul.f32 0.125, %v1063_v7 }
0x1426   :  { %v1065_v10 = vsub.f32 %v1058_v3, %v1064_v8 }
0x1428   :  { %v1066_v11 = vmul.f32 %v1065_v10, %v1065_v10 }
0x142a   :  { %v1067_v12 = vsel %vm247_vm5, %v1066_v11, 0.0 }
0x142b   :  { %1068 = vadd.xlane.f32.xlu1 %v1067_v12 }
0x143c   :  { %1081 = vperm.xlu1 %2201, %v889_v14  }
0x1440   :  { %1093 = vperm.xlu1 %2201, %v2567_v15  }
0x14b8   :  { %v1069_v16 = vpop.xlane.xlu1 %1068 }
0x14b9   :  { %v1070_v17 = vmul.f32 0.125, %v1069_v16 }
0x14bb   :  { %v1071_v18 = vadd.f32 1e-05, %v1070_v17 }
0x14bc   :  { %v1082_v28 = vpop.permute.xlu1 %1081 }
0x14bd   :  { %2220 = vrsqrt.f32 %v1071_v18 }
0x14c0   :  { %v1094_v33 = vpop.permute.xlu1 %1093 }
0x14c1   :  { %v1096_v35 = vmul.f32 %v2324_v5, %v1094_v33 }
0x14c7   :  { %v2221_v20 = vpop.eup %2220 }
0x14c8   :  { %v1073_v21 = vmul.f32 %v2221_v20, %v1065_v10 }
0x14ca   :  { %v1074_v22 = vmul.f32 %v2397_v54, %v1073_v21 }
0x14cc   :  { %v1075_v26 = vadd.f32 %v2402_v56, %v1074_v22 }
0x14ce   :  { %vm1076_vm14 = vcmp.gt.f32.partialorder %v1075_v26, 0.0  ;;  %v1077_v24 = vmul.f32 0.1, %v1075_v26 }
0x14d0   :  { %v1078_v27 = vsel %vm1076_vm14, %v1075_v26, %v1077_v24 }
0x14d1   :  { %v1084_v29 = vmul.f32 %v1082_v28, %v1078_v27 }
0x14d3   :  { %v2573_v31 = vadd.f32 %v1084_v29, %v2531_v40 }
0x14d5   :  { %1086 = vst.msk [vmem:[%s2726_s10 + $0x8] sm:$0x3] %vm247_vm5, %v2573_v31  ;;  %2079 = vmatmul.mubr.msk.f32.vlgmr.msra.gmra.mrb[12].mxu0 %vm62_vm0, %v2573_v31 }
0x14d6   :  { %2172 = vmatpush3.bf16.msra.mxu0 %v2346_v23  ;;  %2089 = vmatprep.mubr.msk.f32.mxu0 %vm2235_vm1, %v2234_v0 }
0x14d7   :  { %2173 = vmatprep.subr.bf16.mxu0 %v2237_v19 }
0x14da   :  { %2175 = vmatpush3.bf16.msra.mxu0 %v2352_v25 }
0x14db   :  { %2108 = vmatprep.subr.mxu0 %v2234_v0 }
0x15a8   :  { %v1166_v34 = vpop.f32.mrb[12].mxu0 }
0x15a9   :  { %v1167_v36 = vadd.f32 %v1166_v34, %v1096_v35  ;;  %v2080_v38 = vpop.f32.mrb[13].mxu0 }
0x15ab   :  { %v1170_v39 = vadd.f32 %v2330_v9, %v1167_v36 }
0x15ad   :  { %v1171_v40 = vsel %vm141_vm2, %v1170_v39, 0.0 }
0x15ae   :  { %1172 = vadd.xlane.f32.xlu1 %v1171_v40 }
0x163b   :  { %v1173_v41 = vpop.xlane.xlu1 %1172 }
0x163c   :  { %v1174_v43 = vmul.f32 0.03125, %v1173_v41 }
0x163e   :  { %v1175_v42 = vsub.f32 %v1170_v39, %v1174_v43 }
0x1640   :  { %v1176_v44 = vmul.f32 %v1175_v42, %v1175_v42 }
0x1642   :  { %v1177_v45 = vsel %vm141_vm2, %v1176_v44, 0.0 }
0x1643   :  { %1178 = vadd.xlane.f32.xlu0 %v1177_v45 }
0x16d0   :  { %v1179_v46 = vpop.xlane.xlu0 %1178 }
0x16d1   :  { %v1180_v47 = vmul.f32 0.03125, %v1179_v46 }
0x16d3   :  { %v1181_v48 = vadd.f32 1e-05, %v1180_v47  ;;  %v1690_v47 = vld [vmem:[%s2726_s10] sm:$0xff] }
0x16d5   :  { %2222 = vrsqrt.f32 %v1181_v48 }
0x16df   :  { %v2223_v50 = vpop.eup %2222 }
0x16e0   :  { %v1183_v49 = vmul.f32 %v2223_v50, %v1175_v42 }
0x16e2   :  { %v1184_v51 = vmul.f32 %v2360_v30, %v1183_v49 }
0x16e4   :  { %v1185_v52 = vadd.f32 %v2365_v32, %v1184_v51 }
0x16e6   :  { %vm1186_vm15 = vcmp.gt.f32.partialorder %v1185_v52, 0.0  ;;  %v1187_v53 = vmul.f32 0.1, %v1185_v52 }
0x16e8   :  { %v1188_v55 = vsel %vm1186_vm15, %v1185_v52, %v1187_v53 }
0x16e9   :  { %2090 = vmatmul.mubr.msk.f32.vlgmr.msra.gmra.mrb[14].mxu0 %vm173_vm4, %v1188_v55 }
0x16ea   :  { %2109 = vmatpush3.msra.mxu0 %v2297_v1  ;;  %2110 = vmatprep.mubr.msk.f32.mxu0 %vm2235_vm1, %v2234_v0  ;;  %v1914_v1 = vld [vmem:[%s2722_s1 + $0xc] sm:$0x3] }
0x16eb   :  { %2182 = vmatprep.subr.bf16.mxu0 %v2237_v19  ;;  %v1090_v4 = vsub.f32 %v1914_v1, %v2567_v15 }
0x17bc   :  { %v1258_v57 = vpop.f32.mrb[14].mxu0 }
0x17bd   :  { %v1259_v58 = vadd.f32 %v2379_v37, %v1258_v57  ;;  %v2091_v59 = vpop.f32.mrb[15].mxu0 }
0x17be   :  { %v1918_v59 = vld [vmem:[%s2722_s1 + $0xe] sm:$0x3] }
0x17bf   :  { %v1262_v60 = vsel %vm247_vm5, %v1259_v58, 0.0 }
0x17c0   :  { %1263 = vadd.xlane.f32.xlu0 %v1262_v60  ;;  %v1291_v60 = vsub.f32 %v1918_v59, %v2609_v6  ;;  %v1786_v59 = vld [vmem:[%s2728_s7 + $0x10] sm:$0xff] }
0x184d   :  { %v1264_v61 = vpop.xlane.xlu0 %1263 }
0x184e   :  { %v1265_v62 = vmul.f32 0.125, %v1264_v61  ;;  %v1921_v61 = vld [vmem:[%s2722_s1 + $0xe] sm:$0x3] }
0x1850   :  { %v1266_v63 = vsub.f32 %v1259_v58, %v1265_v62 }
0x1852   :  { %v1267_v2 = vmul.f32 %v1266_v63, %v1266_v63 }
0x1854   :  { %v1268_v3 = vsel %vm247_vm5, %v1267_v2, 0.0 }
0x1855   :  { %1269 = vadd.xlane.f32.xlu0 %v1268_v3 }
0x186b   :  { %1282 = vperm.xlu0 %2200, %v1090_v4  }
0x186f   :  { %1294 = vperm.xlu0 %2200, %v2609_v6  }
0x18e2   :  { %v1270_v7 = vpop.xlane.xlu0 %1269 }
0x18e3   :  { %v1271_v8 = vmul.f32 0.125, %v1270_v7 }
0x18e5   :  { %v1272_v10 = vadd.f32 1e-05, %v1271_v8 }
0x18e7   :  { %2224 = vrsqrt.f32 %v1272_v10 }
0x18ea   :  { %v1283_v17 = vpop.permute.xlu0 %1282 }
0x18ee   :  { %v1295_v21 = vpop.permute.xlu0 %1294 }
0x18ef   :  { %v1297_v22 = vmul.f32 %v2324_v5, %v1295_v21 }
0x18f1   :  { %v2225_v11 = vpop.eup %2224 }
0x18f2   :  { %v1274_v12 = vmul.f32 %v2225_v11, %v1266_v63 }
0x18f4   :  { %v1275_v13 = vmul.f32 %v2397_v54, %v1274_v12 }
0x18f6   :  { %v1276_v14 = vadd.f32 %v2402_v56, %v1275_v13 }
0x18f8   :  { %vm1277_vm3 = vcmp.gt.f32.partialorder %v1276_v14, 0.0  ;;  %v1278_v15 = vmul.f32 0.1, %v1276_v14 }
0x18fa   :  { %v1279_v16 = vsel %vm1277_vm3, %v1276_v14, %v1278_v15 }
0x18fb   :  { %v1285_v18 = vmul.f32 %v1283_v17, %v1279_v16 }
0x18fd   :  { %v2615_v20 = vadd.f32 %v1285_v18, %v2573_v31 }
0x18ff   :  { %1287 = vst.msk [vmem:[%s2726_s10 + $0xa] sm:$0x3] %vm247_vm5, %v2615_v20  ;;  %2095 = vmatmul.mubr.msk.f32.vlgmr.msra.gmra.mrb[8].mxu1 %vm62_vm0, %v2615_v20 }
0x1900   :  { %2178 = vmatpush3.bf16.msra.mxu1 %v2346_v23  ;;  %2105 = vmatprep.mubr.msk.f32.mxu1 %vm2235_vm1, %v2234_v0 }
0x1901   :  { %2179 = vmatprep.subr.bf16.mxu1 %v2237_v19 }
0x1904   :  { %2181 = vmatpush3.bf16.msra.mxu1 %v2352_v25 }
0x19d2   :  { %v1367_v26 = vpop.f32.mrb[8].mxu1 }
0x19d3   :  { %v1368_v24 = vadd.f32 %v1367_v26, %v1297_v22  ;;  %v2096_v27 = vpop.f32.mrb[9].mxu1 }
0x19d5   :  { %v1371_v28 = vadd.f32 %v2330_v9, %v1368_v24 }
0x19d7   :  { %v1372_v29 = vsel %vm141_vm2, %v1371_v28, 0.0 }
0x19d8   :  { %1373 = vadd.xlane.f32.xlu1 %v1372_v29 }
0x1a65   :  { %v1374_v31 = vpop.xlane.xlu1 %1373 }
0x1a66   :  { %v1375_v33 = vmul.f32 0.03125, %v1374_v31 }
0x1a68   :  { %v1376_v35 = vsub.f32 %v1371_v28, %v1375_v33 }
0x1a6a   :  { %v1377_v34 = vmul.f32 %v1376_v35, %v1376_v35 }
0x1a6c   :  { %v1378_v36 = vsel %vm141_vm2, %v1377_v34, 0.0 }
0x1a6d   :  { %1379 = vadd.xlane.f32.xlu0 %v1378_v36 }
0x1afa   :  { %v1380_v38 = vpop.xlane.xlu0 %1379 }
0x1afb   :  { %v1381_v39 = vmul.f32 0.03125, %v1380_v38 }
0x1afd   :  { %v1382_v40 = vadd.f32 1e-05, %v1381_v39 }
0x1aff   :  { %2226 = vrsqrt.f32 %v1382_v40 }
0x1b09   :  { %v2227_v41 = vpop.eup %2226 }
0x1b0a   :  { %v1384_v43 = vmul.f32 %v2227_v41, %v1376_v35 }
0x1b0c   :  { %v1385_v42 = vmul.f32 %v2360_v30, %v1384_v43 }
0x1b0e   :  { %v1386_v44 = vadd.f32 %v2365_v32, %v1385_v42 }
0x1b10   :  { %vm1387_vm6 = vcmp.gt.f32.partialorder %v1386_v44, 0.0  ;;  %v1388_v45 = vmul.f32 0.1, %v1386_v44 }
0x1b12   :  { %v1389_v46 = vsel %vm1387_vm6, %v1386_v44, %v1388_v45 }
0x1b13   :  { %2106 = vmatmul.mubr.msk.f32.vlgmr.msra.gmra.mrb[10].mxu1 %vm173_vm4, %v1389_v46 }
0x1b14   :  { %2126 = vmatprep.mubr.msk.f32.mxu1 %vm62_vm0, %v1690_v47 }
0x1be6   :  { %v1459_v48 = vpop.f32.mrb[10].mxu1 }
0x1be7   :  { %v1460_v50 = vadd.f32 %v2379_v37, %v1459_v48  ;;  %v2107_v49 = vpop.f32.mrb[11].mxu1 }
0x1be9   :  { %v1463_v51 = vsel %vm247_vm5, %v1460_v50, 0.0 }
0x1bea   :  { %1464 = vadd.xlane.f32.xlu1 %v1463_v51 }
0x1c77   :  { %v1465_v52 = vpop.xlane.xlu1 %1464 }
0x1c78   :  { %v1466_v53 = vmul.f32 0.125, %v1465_v52 }
0x1c7a   :  { %v1467_v55 = vsub.f32 %v1460_v50, %v1466_v53 }
0x1c7c   :  { %v1468_v57 = vmul.f32 %v1467_v55, %v1467_v55 }
0x1c7e   :  { %v1469_v58 = vsel %vm247_vm5, %v1468_v57, 0.0 }
0x1c7f   :  { %1470 = vadd.xlane.f32.xlu1 %v1469_v58 }
0x1c90   :  { %1483 = vperm.xlu1 %2201, %v1291_v60   ;;  %v1787_v60 = vld [vmem:[%s2728_s7 + $0x18] sm:$0xff] }
0x1c94   :  { %1495 = vperm.xlu1 %2201, %v1921_v61  }
0x1d0c   :  { %v1471_v62 = vpop.xlane.xlu1 %1470 }
0x1d0d   :  { %v1472_v63 = vmul.f32 0.125, %v1471_v62  ;;  %v1925_v62 = vld [vmem:[%s2723_s3 + $0x4] ss:$0 sm:$0xff] }
0x1d0f   :  { %v1473_v2 = vadd.f32 1e-05, %v1472_v63 }
0x1d10   :  { %v1484_v6 = vpop.permute.xlu1 %1483 }
0x1d11   :  { %2228 = vrsqrt.f32 %v1473_v2 }
0x1d14   :  { %v1496_v13 = vpop.permute.xlu1 %1495 }
0x1d15   :  { %v1498_v14 = vmul.f32 %v2324_v5, %v1496_v13 }
0x1d1b   :  { %v2229_v3 = vpop.eup %2228 }
0x1d1c   :  { %v1475_v1 = vmul.f32 %v2229_v3, %v1467_v55 }
0x1d1e   :  { %v1476_v4 = vmul.f32 %v2397_v54, %v1475_v1 }
0x1d20   :  { %v1477_v7 = vadd.f32 %v2402_v56, %v1476_v4 }
0x1d22   :  { %vm1478_vm7 = vcmp.gt.f32.partialorder %v1477_v7, 0.0  ;;  %v1479_v8 = vmul.f32 0.1, %v1477_v7 }
0x1d24   :  { %v1480_v10 = vsel %vm1478_vm7, %v1477_v7, %v1479_v8 }
0x1d25   :  { %v1486_v11 = vmul.f32 %v1484_v6, %v1480_v10  ;;  %v1928_v6 = vld [vmem:[%s2729_s8] ss:$0 sm:$0xff] }
0x1d27   :  { %v2653_v12 = vadd.f32 %v1486_v11, %v2615_v20 }
0x1d29   :  { %1488 = vst.msk [vmem:[%s2726_s10 + $0xc] sm:$0x3] %vm247_vm5, %v2653_v12  ;;  %2111 = vmatmul.mubr.msk.f32.vlgmr.msra.gmra.mrb[16].mxu0 %vm62_vm0, %v2653_v12 }
0x1d2a   :  { %2184 = vmatpush3.bf16.msra.mxu0 %v2346_v23  ;;  %2121 = vmatprep.mubr.msk.f32.mxu0 %vm2235_vm1, %v2234_v0 }
0x1d2b   :  { %2185 = vmatprep.subr.bf16.mxu0 %v2237_v19 }
0x1d2e   :  { %2187 = vmatpush3.bf16.msra.mxu0 %v2352_v25 }
0x1dfc   :  { %v1568_v15 = vpop.f32.mrb[16].mxu0 }
0x1dfd   :  { %v1569_v16 = vadd.f32 %v1568_v15, %v1498_v14  ;;  %v2112_v17 = vpop.f32.mrb[17].mxu0 }
0x1dff   :  { %v1572_v18 = vadd.f32 %v2330_v9, %v1569_v16 }
0x1e01   :  { %v1573_v20 = vsel %vm141_vm2, %v1572_v18, 0.0 }
0x1e02   :  { %1574 = vadd.xlane.f32.xlu1 %v1573_v20 }
0x1e8f   :  { %v1575_v21 = vpop.xlane.xlu1 %1574 }
0x1e90   :  { %v1576_v23 = vmul.f32 0.03125, %v1575_v21 }
0x1e92   :  { %v1577_v22 = vsub.f32 %v1572_v18, %v1576_v23 }
0x1e94   :  { %v1578_v26 = vmul.f32 %v1577_v22, %v1577_v22 }
0x1e96   :  { %v1579_v0 = vsel %vm141_vm2, %v1578_v26, 0.0 }
0x1e97   :  { %1580 = vadd.xlane.f32.xlu0 %v1579_v0 }
0x1f24   :  { %v1581_v19 = vpop.xlane.xlu0 %1580 }
0x1f25   :  { %v1582_v25 = vmul.f32 0.03125, %v1581_v19 }
0x1f27   :  { %v1583_v24 = vadd.f32 1e-05, %v1582_v25 }
0x1f29   :  { %2230 = vrsqrt.f32 %v1583_v24 }
0x1f33   :  { %v2231_v5 = vpop.eup %2230 }
0x1f34   :  { %v1585_v27 = vmul.f32 %v2231_v5, %v1577_v22 }
0x1f36   :  { %v1586_v28 = vmul.f32 %v2360_v30, %v1585_v27 }
0x1f38   :  { %v1587_v9 = vadd.f32 %v2365_v32, %v1586_v28  ;;  %v1922_v32 = vld [vmem:[%s2722_s1 + $0x10] sm:$0x3] }
0x1f39   :  { %v1492_v43 = vsub.f32 %v1922_v32, %v1921_v61  ;;  %v2192_v61 = vpack.c.bf16 %v1787_v60, %v1786_v59 }
0x1f3a   :  { %vm1588_vm1 = vcmp.gt.f32.partialorder %v1587_v9, 0.0  ;;  %v1589_v29 = vmul.f32 0.1, %v1587_v9 }
0x1f3c   :  { %v1590_v31 = vsel %vm1588_vm1, %v1587_v9, %v1589_v29 }
0x1f3d   :  { %2122 = vmatmul.mubr.msk.f32.vlgmr.msra.gmra.mrb[18].mxu0 %vm173_vm4, %v1590_v31 }
0x2010   :  { %v1660_v33 = vpop.f32.mrb[18].mxu0 }
0x2011   :  { %v1661_v35 = vadd.f32 %v2379_v37, %v1660_v33  ;;  %v2123_v34 = vpop.f32.mrb[19].mxu0  ;;  %v1692_v37 = vld [vmem:[%s2727_s6] sm:$0xff] }
0x2012   :  { %2124 = vmatprep.subr.mxu1 %v1692_v37 }
0x2013   :  { %v1664_v36 = vsel %vm247_vm5, %v1661_v35, 0.0  ;;  %2125 = vmatpush3.msra.mxu1 %v1692_v37 }
0x2014   :  { %1665 = vadd.xlane.f32.xlu0 %v1664_v36 }
0x20a1   :  { %v1666_v38 = vpop.xlane.xlu0 %1665 }
0x20a2   :  { %v1667_v39 = vmul.f32 0.125, %v1666_v38 }
0x20a4   :  { %v1668_v40 = vsub.f32 %v1661_v35, %v1667_v39 }
0x20a6   :  { %v1669_v41 = vmul.f32 %v1668_v40, %v1668_v40 }
0x20a8   :  { %v1670_v30 = vsel %vm247_vm5, %v1669_v41, 0.0 }
0x20a9   :  { %1671 = vadd.xlane.f32.xlu0 %v1670_v30 }
0x20bf   :  { %1684 = vperm.xlu0 %2200, %v1492_v43  }
0x2136   :  { %v1672_v42 = vpop.xlane.xlu0 %1671 }
0x2137   :  { %v1673_v44 = vmul.f32 0.125, %v1672_v42 }
0x2139   :  { %v1674_v45 = vadd.f32 1e-05, %v1673_v44 }
0x213b   :  { %2232 = vrsqrt.f32 %v1674_v45 }
0x213e   :  { %v1685_v52 = vpop.permute.xlu0 %1684 }
0x2145   :  { %v2233_v46 = vpop.eup %2232 }
0x2146   :  { %v1676_v47 = vmul.f32 %v2233_v46, %v1668_v40 }
0x2148   :  { %v1677_v48 = vmul.f32 %v2397_v54, %v1676_v47  ;;  %v1784_v54 = vld [vmem:[%s2728_s7] sm:$0xff] }
0x214a   :  { %v1678_v50 = vadd.f32 %v2402_v56, %v1677_v48  ;;  %v1785_v56 = vld [vmem:[%s2728_s7 + $0x8] sm:$0xff] }
0x214b   :  { %v2188_v58 = vpack.c.bf16 %v1785_v56, %v1784_v54 }
0x214c   :  { %vm1679_vm2 = vcmp.gt.f32.partialorder %v1678_v50, 0.0  ;;  %v1680_v49 = vmul.f32 0.1, %v1678_v50 }
0x214d   :  { %2189 = vmatprep.subr.bf16.mxu1 %v2188_v58 }
0x214e   :  { %v1681_v51 = vsel %vm1679_vm2, %v1678_v50, %v1680_v49 }
0x214f   :  { %v1687_v53 = vmul.f32 %v1685_v52, %v1681_v51 }
0x2151   :  { %v1688_v55 = vadd.f32 %v1687_v53, %v2653_v12 }
0x2153   :  { %1689 = vst.msk [vmem:[%s2726_s10 + $0xe] sm:$0x3] %vm247_vm5, %v1688_v55 }
0x215a   :  { %v1691_v57 = vld [vmem:[%s2726_s10 + $0x8] sm:$0xff] }
0x215b   :  { %2127 = vmatmul.mubr.msk.f32.vlgmr.msra.gmra.mrb[12].mxu1 %vm62_vm0, %v1691_v57 }
0x215c   :  { %2191 = vmatpush3.bf16.msra.mxu1 %v2188_v58 }
0x215d   :  { %2193 = vmatprep.subr.bf16.mxu1 %v2192_v61 }
0x2160   :  { %2195 = vmatpush3.bf16.msra.mxu1 %v2192_v61 }
0x222e   :  { %v2128_v63 = vpop.f32.mrb[12].mxu1 }
0x222f   :  { %v1775_v2 = vadd.f32 %v2128_v63, %v1925_v62  ;;  %v1769_v3 = vpop.f32.mrb[13].mxu1 }
0x2230   :  { %v1770_v1 = vadd.f32 %v1925_v62, %v1769_v3 }
0x2231   :  { %v1781_v4 = vmul.f32 0.1, %v1775_v2  ;;  %vm1779_vm0 = vcmp.gt.f32.partialorder %v1775_v2, 0.0 }
0x2232   :  { %vm1778_vm5 = vcmp.gt.f32.partialorder %v1770_v1, 0.0  ;;  %v1780_v7 = vmul.f32 0.1, %v1770_v1 }
0x2233   :  { %v1783_v10 = vsel %vm1779_vm0, %v1775_v2, %v1781_v4 }
0x2234   :  { %v1782_v8 = vsel %vm1778_vm5, %v1770_v1, %v1780_v7 }
0x2235   :  { %2137 = vmatprep.mubr.msk.f32.mxu1 %vm173_vm4, %v1782_v8 }
0x2236   :  { %2138 = vmatmul.mubr.msk.f32.vlgmr.msra.gmra.mrb[14].mxu1 %vm173_vm4, %v1783_v10 }
0x2309   :  { %v2139_v11 = vpop.f32.mrb[14].mxu1 }
0x230a   :  { %v1873_v12 = vadd.f32 %v2139_v11, %v1928_v6  ;;  %v1867_v13 = vpop.f32.mrb[15].mxu1 }
0x230b   :  { %v1868_v14 = vadd.f32 %v1928_v6, %v1867_v13 }
0x230c   :  { %1878 = vst.msk [vmem:[%s2730_s9 + $0x8] sm:$0xff] %vm1876_vm8, %v1873_v12 }
0x230d   :  { %1877 = vst.msk [vmem:[%s2730_s9] sm:$0xff] %vm1876_vm8, %v1868_v14 }

</bundles_post_ra>
